<compile_context>
chip_gen: v7x
topology: tpu7x:2x2x1
jax: 0.10.0
libtpu: 0.0.40
codegen_flags: <defaults>
</compile_context>

<pallas_src>
import math

import jax
import jax.numpy as jnp
from jax import lax
from jax.experimental import pallas as pl
from jax.experimental.pallas import tpu as pltpu

# ---- small synthetic config (real xlm-mlm-100-1280 is H=1280, 16 layers) ----
B, S, H, NH, NL = 2, 8, 32, 4, 2     # batch, seq, hidden, heads, layers
FF = 4 * H                           # FFN inner dim
VOCAB = 64
NUM_LABELS = 3
DH = H // NH
M = B * S                            # batch folded into the matmul M dimension
LN_EPS = 1e-12
F32 = jnp.float32
BF16 = jnp.bfloat16


# ----------------------------- in-kernel helpers -----------------------------
def _linear(x_bf16, w_bf16, b_f32):
    # x: [rows, in] bf16, w: [out, in] (PyTorch nn.Linear) bf16, b: [1, out] f32.
    # bf16 MXU inputs, f32 accumulation.
    y = lax.dot_general(x_bf16, w_bf16, (((1,), (1,)), ((), ())),
                        preferred_element_type=F32)
    return y + b_f32


def _layer_norm(x, g, b, eps=LN_EPS):
    mu = jnp.mean(x, axis=-1, keepdims=True)
    var = jnp.mean((x - mu) ** 2, axis=-1, keepdims=True)
    return (x - mu) * lax.rsqrt(var + eps) * g + b


def _gelu(x):
    # tanh-approx GELU: transcendental work goes to the EUP slot (idle while
    # the MXU/VPU are busy) instead of a long VALU erf polynomial.
    # TODO(synk): HF XLM uses exact erf GELU; switch to lax.erf once Mosaic
    # exposes a native erf lowering if strict numerical parity is required.
    c = math.sqrt(2.0 / math.pi)
    return 0.5 * x * (1.0 + jnp.tanh(c * (x + 0.044715 * x * x * x)))


def _softmax_last(x):
    m = jnp.max(x, axis=-1, keepdims=True)
    e = jnp.exp(x - m)
    return e * pl.reciprocal(jnp.sum(e, axis=-1, keepdims=True), approx=True)


# --------------------------------- fused kernel -------------------------------
def _xlm_fused_kernel(emb_ref, mcol_ref, bias_ref, lng_ref, lnb_ref,
                      qkvw_ref, qkvb_ref, ow_ref, ob_ref, ln1g_ref, ln1b_ref,
                      w1_ref, b1_ref, w2_ref, b2_ref, ln2g_ref, ln2b_ref,
                      clsw_ref, clsb_ref, onehot_ref,
                      logits_ref, nll_ref, h_ref):
    l = pl.program_id(0)                      # layer index
    mcol = mcol_ref[...]                      # [B*S, 1] padding-mask column

    # ----- layer-0 prologue: embedding LayerNorm + padding-mask multiply -----
    @pl.when(l == 0)
    def _():
        y = _layer_norm(emb_ref[...], lng_ref[...], lnb_ref[...])
        h_ref[...] = y * mcol                 # XLM's `tensor *= mask[..., None]`

    x = h_ref[...]                            # [B*S, H] f32, VMEM-resident
    xb = x.astype(BF16)

    # ----- self-attention: fused QKV projection, heads batched over NH*B -----
    # 1/sqrt(DH) is folded into the Q rows of qkvw/qkvb at construction time.
    qkv = _linear(xb, qkvw_ref[0], qkvb_ref[0])           # [B*S, 3H] f32

    # Head split via static lane slices + leading-dim concat (safe lowering).
    # TODO(synk): at real scale (DH = 1280/16 = 80, not lane aligned) use a
    # DH-padded / head-blocked QKV & O weight layout (or pltpu.einshape) so the
    # split and the ctx merge become no-op relayouts instead of NH copies.
    def split_heads(base):
        return jnp.concatenate(
            [qkv[:, base + n * DH: base + (n + 1) * DH].reshape(B, S, DH)
             for n in range(NH)], axis=0).astype(BF16)    # [NH*B, S, DH]

    qh = split_heads(0)
    kh = split_heads(H)
    vh = split_heads(2 * H)

    scores = lax.dot_general(qh, kh, (((2,), (2,)), ((0,), (0,))),
                             preferred_element_type=F32)  # [NH*B, S, S]
    # bias_ref: [NH*B, 1, S] additive key mask, precomputed in the wrapper.
    # NOTE: padded query rows produce garbage attention output; it is zeroed by
    # the mcol multiply at the end of the layer, matching the reference.
    probs = _softmax_last(scores + bias_ref[...])
    ctx = lax.dot_general(probs.astype(BF16), vh, (((2,), (1,)), ((0,), (0,))),
                          preferred_element_type=F32)     # [NH*B, S, DH]
    # TODO(synk): on v7x at real scale, process heads in groups of ~4 to bound
    # the [NH,S,S] scores/probs VMEM footprint within 64 MiB.
    ctx2 = jnp.concatenate(
        [ctx[n * B:(n + 1) * B].reshape(B * S, DH) for n in range(NH)],
        axis=-1)                                          # [B*S, H]

    attn = _linear(ctx2.astype(BF16), ow_ref[0], ob_ref[0])   # full-K out-proj
    x1 = _layer_norm(x + attn, ln1g_ref[0], ln1b_ref[0])      # layer_norm1

    # ----- feed-forward (GELU) -----
    # TODO(synk): at real scale (H=1280, FF=5120) add an "arbitrary" K-tiling
    # grid axis over FF for w1/w2 so each weight block double-buffers within
    # v7x's 64 MiB VMEM while keeping DMA/compute overlap.
    mid = _gelu(_linear(x1.astype(BF16), w1_ref[0], b1_ref[0]))     # [B*S, FF]
    ffo = _linear(mid.astype(BF16), w2_ref[0], b2_ref[0])           # [B*S, H]
    x2 = _layer_norm(x1 + ffo, ln2g_ref[0], ln2b_ref[0])            # layer_norm2

    h_new = x2 * mcol
    h_ref[...] = h_new                        # carry to next layer

    # ----- last-layer epilogue: SequenceSummary("first") + logits + CE -------
    @pl.when(l == NL - 1)
    def _():
        cls_h = jnp.concatenate(
            [h_new[b * S: b * S + 1, :] for b in range(B)], axis=0)   # [B, H]
        logits = _linear(cls_h.astype(BF16), clsw_ref[...], clsb_ref[...])
        mx = jnp.max(logits, axis=-1, keepdims=True)
        z = logits - mx
        lse = jnp.log(jnp.sum(jnp.exp(z), axis=-1, keepdims=True))
        nll_ref[...] = -jnp.sum(onehot_ref[...] * (z - lse), axis=-1,
                                keepdims=True)                        # [B, 1]
        logits_ref[...] = logits                                      # [B, L]


# ------------------------------ pallas wrapper --------------------------------
_LAYER_PARAM_NAMES = ("qkvw", "qkvb", "ow", "ob", "ln1g", "ln1b",
                      "w1", "b1", "w2", "b2", "ln2g", "ln2b")


def _layer_spec(arr):
    zeros = (0,) * (arr.ndim - 1)
    return pl.BlockSpec((1,) + arr.shape[1:],
                        lambda l, zeros=zeros: (l,) + zeros)


def _const_spec(arr):
    zeros = (0,) * arr.ndim
    return pl.BlockSpec(arr.shape, lambda l, zeros=zeros: zeros)


def xlm_for_sequence_classification(params, input_ids, attention_mask,
                                    token_type_ids, labels):
    """Returns (loss, logits) like OurXLMForSequenceClassification.forward."""
    # Embedding gathers stay in plain JAX (glue); XLM embeds token_type_ids
    # with the word-embedding table. Dropout layers are identity (inference).
    positions = jnp.arange(S, dtype=jnp.int32)
    emb = (jnp.take(params["word_emb"], input_ids, axis=0)
           + jnp.take(params["pos_emb"], positions, axis=0)[None, :, :]
           + jnp.take(params["word_emb"], token_type_ids, axis=0)).astype(F32)
    emb = emb.reshape(M, H)                       # batch folded into matmul M

    mask_f = attention_mask.astype(F32)           # [B, S]
    mcol = mask_f.reshape(M, 1)                   # `tensor *= mask[..., None]`
    # Additive key-mask bias, computed once here and broadcast over heads
    # (head-major ordering matches the in-kernel [NH*B, S, DH] batching).
    bias = jnp.broadcast_to(((mask_f - 1.0) * 1e9)[None, :, None, :],
                            (NH, B, 1, S)).reshape(NH * B, 1, S)
    onehot = jax.nn.one_hot(labels, NUM_LABELS, dtype=F32)            # [B, L]

    layer_args = [params[n] for n in _LAYER_PARAM_NAMES]

    in_specs = ([_const_spec(emb), _const_spec(mcol), _const_spec(bias),
                 _const_spec(params["ln_emb_g"]), _const_spec(params["ln_emb_b"])]
                + [_layer_spec(a) for a in layer_args]
                + [_const_spec(params["cls_w"]), _const_spec(params["cls_b"]),
                   _const_spec(onehot)])

    logits, nll = pl.pallas_call(
        _xlm_fused_kernel,
        out_shape=(jax.ShapeDtypeStruct((B, NUM_LABELS), F32),
                   jax.ShapeDtypeStruct((B, 1), F32)),
        grid=(NL,),                               # layers only; batch lives in M
        in_specs=in_specs,
        out_specs=(pl.BlockSpec((B, NUM_LABELS), lambda l: (0, 0)),
                   pl.BlockSpec((B, 1), lambda l: (0, 0))),
        scratch_shapes=[pltpu.VMEM((M, H), F32)],  # resident activations
        # TODO(synk): at real scale derive vmem_limit_bytes from the actual
        # block footprint (double-buffered layer weights + activations +
        # scores) leaving headroom, and on v7x add a leading 2-wide "parallel"
        # batch-chunk grid axis so both TensorCores stream the weights once.
        compiler_params=pltpu.CompilerParams(
            dimension_semantics=("arbitrary",)),
    )(emb, mcol, bias, params["ln_emb_g"], params["ln_emb_b"],
      *layer_args, params["cls_w"], params["cls_b"], onehot)

    # CrossEntropyLoss(reduction='mean') over the B per-example NLLs (glue).
    loss = jnp.mean(nll)
    return loss, logits


# -------------------------------- parameters ----------------------------------
def init_params(key):
    keys = jax.random.split(key, 9)
    std = 0.02
    scale = 1.0 / math.sqrt(DH)          # attention scale folded into Q rows

    def nrm(k, shape):
        return jax.random.normal(k, shape, F32) * std

    qw = nrm(keys[3], (NL, H, H)) * scale
    kw = nrm(keys[4], (NL, H, H))
    vw = nrm(keys[5], (NL, H, H))
    return {
        "word_emb": nrm(keys[0], (VOCAB, H)),
        "pos_emb": nrm(keys[1], (S, H)),
        "ln_emb_g": jnp.ones((1, H), F32),
        "ln_emb_b": jnp.zeros((1, H), F32),
        "cls_w": nrm(keys[2], (NUM_LABELS, H)).astype(BF16),
        "cls_b": jnp.zeros((1, NUM_LABELS), F32),
        # Stacked per-layer weights [NL, ...]; matmul weights bf16 (MXU),
        # biases / LayerNorm params stay f32 (added after f32 accumulation).
        # Fused QKV: output rows [0,H)=Q (pre-scaled), [H,2H)=K, [2H,3H)=V.
        "qkvw": jnp.concatenate([qw, kw, vw], axis=1).astype(BF16),  # [NL,3H,H]
        "qkvb": jnp.zeros((NL, 1, 3 * H), F32),   # Q slice would also be scaled
        "ow": nrm(keys[6], (NL, H, H)).astype(BF16),
        "ob": jnp.zeros((NL, 1, H), F32),
        "ln1g": jnp.ones((NL, 1, H), F32),
        "ln1b": jnp.zeros((NL, 1, H), F32),
        "w1": nrm(keys[7], (NL, FF, H)).astype(BF16),
        "b1": jnp.zeros((NL, 1, FF), F32),
        "w2": nrm(keys[8], (NL, H, FF)).astype(BF16),
        "b2": jnp.zeros((NL, 1, H), F32),
        "ln2g": jnp.ones((NL, 1, H), F32),
        "ln2b": jnp.zeros((NL, 1, H), F32),
    }


# ----------------------------------- main --------------------------------------
if __name__ == "__main__":
    key = jax.random.PRNGKey(0)
    pkey, dkey = jax.random.split(key)
    params = init_params(pkey)

    id_key, lab_key = jax.random.split(dkey)
    input_ids = jax.random.randint(id_key, (B, S), 0, VOCAB, dtype=jnp.int32)
    attention_mask = jnp.array([[1] * S,
                                [1] * 5 + [0] * (S - 5)], dtype=jnp.int32)
    token_type_ids = jnp.zeros((B, S), dtype=jnp.int32)
    labels = jax.random.randint(lab_key, (B,), 0, NUM_LABELS, dtype=jnp.int32)

    fwd = jax.jit(xlm_for_sequence_classification)
    loss, logits = fwd(params, input_ids, attention_mask, token_type_ids, labels)
    jax.block_until_ready((loss, logits))
    assert logits.shape == (B, NUM_LABELS) and loss.shape == ()
    assert bool(jnp.isfinite(loss)) and bool(jnp.all(jnp.isfinite(logits)))
    print("KERNEL_OK")
</pallas_src>

<mosaic_0001>
module attributes {stable_mosaic.version = 11 : i64} {
  func.func @_xlm_fused_kernel(%arg0: i32, %arg1: memref<16x32xf32, #tpu.memory_space<vmem>>, %arg2: memref<16x1xf32, #tpu.memory_space<vmem>>, %arg3: memref<8x1x8xf32, #tpu.memory_space<vmem>>, %arg4: memref<1x32xf32, #tpu.memory_space<vmem>>, %arg5: memref<1x32xf32, #tpu.memory_space<vmem>>, %arg6: memref<1x96x32xbf16, #tpu.memory_space<vmem>>, %arg7: memref<1x1x96xf32, #tpu.memory_space<vmem>>, %arg8: memref<1x32x32xbf16, #tpu.memory_space<vmem>>, %arg9: memref<1x1x32xf32, #tpu.memory_space<vmem>>, %arg10: memref<1x1x32xf32, #tpu.memory_space<vmem>>, %arg11: memref<1x1x32xf32, #tpu.memory_space<vmem>>, %arg12: memref<1x128x32xbf16, #tpu.memory_space<vmem>>, %arg13: memref<1x1x128xf32, #tpu.memory_space<vmem>>, %arg14: memref<1x32x128xbf16, #tpu.memory_space<vmem>>, %arg15: memref<1x1x32xf32, #tpu.memory_space<vmem>>, %arg16: memref<1x1x32xf32, #tpu.memory_space<vmem>>, %arg17: memref<1x1x32xf32, #tpu.memory_space<vmem>>, %arg18: memref<3x32xbf16, #tpu.memory_space<vmem>>, %arg19: memref<1x3xf32, #tpu.memory_space<vmem>>, %arg20: memref<2x3xf32, #tpu.memory_space<vmem>>, %arg21: memref<2x3xf32, #tpu.memory_space<vmem>>, %arg22: memref<2x1xf32, #tpu.memory_space<vmem>>, %arg23: memref<16x32xf32, #tpu.memory_space<vmem>>) attributes {dimension_semantics = [#tpu.dimension_semantics<arbitrary>], iteration_bounds = array<i64: 2>, scalar_prefetch = 0 : i64, scratch_operands = 1 : i64, tpu.core_type = #tpu.core_type<tc>, window_params = [{pipeline_mode = #tpu.pipeline_mode<synchronous>, transform_indices = @transform_0, window_bounds = array<i64: 16, 32>}, {pipeline_mode = #tpu.pipeline_mode<synchronous>, transform_indices = @transform_1, window_bounds = array<i64: 16, 1>}, {pipeline_mode = #tpu.pipeline_mode<synchronous>, transform_indices = @transform_2, window_bounds = array<i64: 8, 1, 8>}, {pipeline_mode = #tpu.pipeline_mode<synchronous>, transform_indices = @transform_3, window_bounds = array<i64: 1, 32>}, {pipeline_mode = #tpu.pipeline_mode<synchronous>, transform_indices = @transform_4, window_bounds = array<i64: 1, 32>}, {transform_indices = @transform_5, window_bounds = array<i64: 1, 96, 32>}, {transform_indices = @transform_6, window_bounds = array<i64: 1, 1, 96>}, {transform_indices = @transform_7, window_bounds = array<i64: 1, 32, 32>}, {transform_indices = @transform_8, window_bounds = array<i64: 1, 1, 32>}, {transform_indices = @transform_9, window_bounds = array<i64: 1, 1, 32>}, {transform_indices = @transform_10, window_bounds = array<i64: 1, 1, 32>}, {transform_indices = @transform_11, window_bounds = array<i64: 1, 128, 32>}, {transform_indices = @transform_12, window_bounds = array<i64: 1, 1, 128>}, {transform_indices = @transform_13, window_bounds = array<i64: 1, 32, 128>}, {transform_indices = @transform_14, window_bounds = array<i64: 1, 1, 32>}, {transform_indices = @transform_15, window_bounds = array<i64: 1, 1, 32>}, {transform_indices = @transform_16, window_bounds = array<i64: 1, 1, 32>}, {pipeline_mode = #tpu.pipeline_mode<synchronous>, transform_indices = @transform_17, window_bounds = array<i64: 3, 32>}, {pipeline_mode = #tpu.pipeline_mode<synchronous>, transform_indices = @transform_18, window_bounds = array<i64: 1, 3>}, {pipeline_mode = #tpu.pipeline_mode<synchronous>, transform_indices = @transform_19, window_bounds = array<i64: 2, 3>}, {pipeline_mode = #tpu.pipeline_mode<synchronous>, transform_indices = @transform_20, window_bounds = array<i64: 2, 3>}, {pipeline_mode = #tpu.pipeline_mode<synchronous>, transform_indices = @transform_21, window_bounds = array<i64: 2, 1>}]} {
    %c0 = arith.constant 0 : index
    %c0_0 = arith.constant 0 : index
    %0 = vector.load %arg2[%c0, %c0_0] : memref<16x1xf32, #tpu.memory_space<vmem>>, vector<16x1xf32>
    %c0_i32 = arith.constant 0 : i32
    %1 = arith.cmpi eq, %arg0, %c0_i32 : i32
    %2 = arith.extui %1 : i1 to i32
    %c0_i32_1 = arith.constant 0 : i32
    %3 = arith.cmpi ne, %2, %c0_i32_1 : i32
    scf.if %3 {
      %c0_67 = arith.constant 0 : index
      %c0_68 = arith.constant 0 : index
      %165 = vector.load %arg1[%c0_67, %c0_68] : memref<16x32xf32, #tpu.memory_space<vmem>>, vector<16x32xf32>
      %c0_69 = arith.constant 0 : index
      %c0_70 = arith.constant 0 : index
      %166 = vector.load %arg4[%c0_69, %c0_70] : memref<1x32xf32, #tpu.memory_space<vmem>>, vector<1x32xf32>
      %c0_71 = arith.constant 0 : index
      %c0_72 = arith.constant 0 : index
      %167 = vector.load %arg5[%c0_71, %c0_72] : memref<1x32xf32, #tpu.memory_space<vmem>>, vector<1x32xf32>
      %cst_73 = arith.constant dense<0.000000e+00> : vector<16xf32>
      %168 = vector.multi_reduction <add>, %165, %cst_73 [1] : vector<16x32xf32> to vector<16xf32>
      %169 = vector.shape_cast %168 : vector<16xf32> to vector<16x1xf32>
      %cst_74 = arith.constant 3.200000e+01 : f32
      %170 = vector.broadcast %cst_74 : f32 to vector<16x1xf32>
      %171 = arith.divf %169, %170 : vector<16x1xf32>
      %172 = vector.broadcast %171 : vector<16x1xf32> to vector<16x32xf32>
      %173 = arith.subf %165, %172 : vector<16x32xf32>
      %174 = arith.mulf %173, %173 : vector<16x32xf32>
      %cst_75 = arith.constant dense<0.000000e+00> : vector<16xf32>
      %175 = vector.multi_reduction <add>, %174, %cst_75 [1] : vector<16x32xf32> to vector<16xf32>
      %176 = vector.shape_cast %175 : vector<16xf32> to vector<16x1xf32>
      %cst_76 = arith.constant 3.200000e+01 : f32
      %177 = vector.broadcast %cst_76 : f32 to vector<16x1xf32>
      %178 = arith.divf %176, %177 : vector<16x1xf32>
      %179 = vector.broadcast %171 : vector<16x1xf32> to vector<16x32xf32>
      %180 = arith.subf %165, %179 : vector<16x32xf32>
      %cst_77 = arith.constant 9.99999996E-13 : f32
      %181 = vector.broadcast %cst_77 : f32 to vector<16x1xf32>
      %182 = arith.addf %178, %181 : vector<16x1xf32>
      %183 = math.rsqrt %182 : vector<16x1xf32>
      %184 = vector.broadcast %183 : vector<16x1xf32> to vector<16x32xf32>
      %185 = arith.mulf %180, %184 : vector<16x32xf32>
      %186 = vector.broadcast %166 : vector<1x32xf32> to vector<16x32xf32>
      %187 = arith.mulf %185, %186 : vector<16x32xf32>
      %188 = vector.broadcast %167 : vector<1x32xf32> to vector<16x32xf32>
      %189 = arith.addf %187, %188 : vector<16x32xf32>
      %190 = vector.broadcast %0 : vector<16x1xf32> to vector<16x32xf32>
      %191 = arith.mulf %189, %190 : vector<16x32xf32>
      %c0_78 = arith.constant 0 : index
      %c0_79 = arith.constant 0 : index
      %192 = vector.load %arg23[%c0_78, %c0_79] : memref<16x32xf32, #tpu.memory_space<vmem>>, vector<16x32xf32>
      tpu.vector_store %arg23[%c0_78, %c0_79], %191 {strides = array<i32>} : memref<16x32xf32, #tpu.memory_space<vmem>>, vector<16x32xf32>,
    } else {
    }
    %c0_2 = arith.constant 0 : index
    %c0_3 = arith.constant 0 : index
    %4 = vector.load %arg23[%c0_2, %c0_3] : memref<16x32xf32, #tpu.memory_space<vmem>>, vector<16x32xf32>
    %5 = arith.truncf %4 : vector<16x32xf32> to vector<16x32xbf16>
    %c0_4 = arith.constant 0 : index
    %c0_5 = arith.constant 0 : index
    %c0_6 = arith.constant 0 : index
    %6 = vector.load %arg6[%c0_4, %c0_5, %c0_6] : memref<1x96x32xbf16, #tpu.memory_space<vmem>>, vector<1x96x32xbf16>
    %7 = vector.shape_cast %6 : vector<1x96x32xbf16> to vector<96x32xbf16>
    %c0_7 = arith.constant 0 : index
    %c0_8 = arith.constant 0 : index
    %c0_9 = arith.constant 0 : index
    %8 = vector.load %arg7[%c0_7, %c0_8, %c0_9] : memref<1x1x96xf32, #tpu.memory_space<vmem>>, vector<1x1x96xf32>
    %9 = vector.shape_cast %8 : vector<1x1x96xf32> to vector<1x96xf32>
    %cst = arith.constant dense<0.000000e+00> : vector<16x96xf32>
    %10 = tpu.matmul %5, %7, %cst {dimension_numbers = #tpu.dot_dimension_numbers<[1], [1], [0], [0], [0, 0, 1, 0], [], []>} : vector<16x32xbf16>, vector<96x32xbf16>, vector<16x96xf32> -> vector<16x96xf32>
    %11 = vector.broadcast %9 : vector<1x96xf32> to vector<16x96xf32>
    %12 = arith.addf %10, %11 : vector<16x96xf32>
    %13 = vector.extract_strided_slice %12 {offsets = [0, 0], sizes = [16, 8], strides = [1, 1]} : vector<16x96xf32> to vector<16x8xf32>
    %14 = vector.shape_cast %13 : vector<16x8xf32> to vector<2x8x8xf32>
    %15 = vector.extract_strided_slice %12 {offsets = [0, 8], sizes = [16, 8], strides = [1, 1]} : vector<16x96xf32> to vector<16x8xf32>
    %16 = vector.shape_cast %15 : vector<16x8xf32> to vector<2x8x8xf32>
    %17 = vector.extract_strided_slice %12 {offsets = [0, 16], sizes = [16, 8], strides = [1, 1]} : vector<16x96xf32> to vector<16x8xf32>
    %18 = vector.shape_cast %17 : vector<16x8xf32> to vector<2x8x8xf32>
    %19 = vector.extract_strided_slice %12 {offsets = [0, 24], sizes = [16, 8], strides = [1, 1]} : vector<16x96xf32> to vector<16x8xf32>
    %20 = vector.shape_cast %19 : vector<16x8xf32> to vector<2x8x8xf32>
    %21 = tpu.concatenate %14, %16, %18, %20 in 0 : vector<2x8x8xf32>, vector<2x8x8xf32>, vector<2x8x8xf32>, vector<2x8x8xf32> -> vector<8x8x8xf32>
    %22 = arith.truncf %21 : vector<8x8x8xf32> to vector<8x8x8xbf16>
    %23 = vector.extract_strided_slice %12 {offsets = [0, 32], sizes = [16, 8], strides = [1, 1]} : vector<16x96xf32> to vector<16x8xf32>
    %24 = vector.shape_cast %23 : vector<16x8xf32> to vector<2x8x8xf32>
    %25 = vector.extract_strided_slice %12 {offsets = [0, 40], sizes = [16, 8], strides = [1, 1]} : vector<16x96xf32> to vector<16x8xf32>
    %26 = vector.shape_cast %25 : vector<16x8xf32> to vector<2x8x8xf32>
    %27 = vector.extract_strided_slice %12 {offsets = [0, 48], sizes = [16, 8], strides = [1, 1]} : vector<16x96xf32> to vector<16x8xf32>
    %28 = vector.shape_cast %27 : vector<16x8xf32> to vector<2x8x8xf32>
    %29 = vector.extract_strided_slice %12 {offsets = [0, 56], sizes = [16, 8], strides = [1, 1]} : vector<16x96xf32> to vector<16x8xf32>
    %30 = vector.shape_cast %29 : vector<16x8xf32> to vector<2x8x8xf32>
    %31 = tpu.concatenate %24, %26, %28, %30 in 0 : vector<2x8x8xf32>, vector<2x8x8xf32>, vector<2x8x8xf32>, vector<2x8x8xf32> -> vector<8x8x8xf32>
    %32 = arith.truncf %31 : vector<8x8x8xf32> to vector<8x8x8xbf16>
    %33 = vector.extract_strided_slice %12 {offsets = [0, 64], sizes = [16, 8], strides = [1, 1]} : vector<16x96xf32> to vector<16x8xf32>
    %34 = vector.shape_cast %33 : vector<16x8xf32> to vector<2x8x8xf32>
    %35 = vector.extract_strided_slice %12 {offsets = [0, 72], sizes = [16, 8], strides = [1, 1]} : vector<16x96xf32> to vector<16x8xf32>
    %36 = vector.shape_cast %35 : vector<16x8xf32> to vector<2x8x8xf32>
    %37 = vector.extract_strided_slice %12 {offsets = [0, 80], sizes = [16, 8], strides = [1, 1]} : vector<16x96xf32> to vector<16x8xf32>
    %38 = vector.shape_cast %37 : vector<16x8xf32> to vector<2x8x8xf32>
    %39 = vector.extract_strided_slice %12 {offsets = [0, 88], sizes = [16, 8], strides = [1, 1]} : vector<16x96xf32> to vector<16x8xf32>
    %40 = vector.shape_cast %39 : vector<16x8xf32> to vector<2x8x8xf32>
    %41 = tpu.concatenate %34, %36, %38, %40 in 0 : vector<2x8x8xf32>, vector<2x8x8xf32>, vector<2x8x8xf32>, vector<2x8x8xf32> -> vector<8x8x8xf32>
    %42 = arith.truncf %41 : vector<8x8x8xf32> to vector<8x8x8xbf16>
    %cst_10 = arith.constant dense<0.000000e+00> : vector<8x8x8xf32>
    %43 = tpu.matmul %22, %32, %cst_10 {dimension_numbers = #tpu.dot_dimension_numbers<[2], [2], [1], [1], [0, 0, 0, 1, 1, 1], [0], [0]>} : vector<8x8x8xbf16>, vector<8x8x8xbf16>, vector<8x8x8xf32> -> vector<8x8x8xf32>
    %c0_11 = arith.constant 0 : index
    %c0_12 = arith.constant 0 : index
    %c0_13 = arith.constant 0 : index
    %44 = vector.load %arg3[%c0_11, %c0_12, %c0_13] : memref<8x1x8xf32, #tpu.memory_space<vmem>>, vector<8x1x8xf32>
    %45 = vector.broadcast %44 : vector<8x1x8xf32> to vector<8x8x8xf32>
    %46 = arith.addf %43, %45 : vector<8x8x8xf32>
    %cst_14 = arith.constant dense<0xFF800000> : vector<8x8xf32>
    %47 = vector.multi_reduction <maximumf>, %46, %cst_14 [2] : vector<8x8x8xf32> to vector<8x8xf32>
    %48 = vector.shape_cast %47 : vector<8x8xf32> to vector<8x8x1xf32>
    %49 = vector.broadcast %48 : vector<8x8x1xf32> to vector<8x8x8xf32>
    %50 = arith.subf %46, %49 : vector<8x8x8xf32>
    %51 = math.exp %50 : vector<8x8x8xf32>
    %cst_15 = arith.constant dense<0.000000e+00> : vector<8x8xf32>
    %52 = vector.multi_reduction <add>, %51, %cst_15 [2] : vector<8x8x8xf32> to vector<8x8xf32>
    %53 = vector.shape_cast %52 : vector<8x8xf32> to vector<8x8x1xf32>
    %54 = tpu.reciprocal %53 {approx = true} : vector<8x8x1xf32> -> vector<8x8x1xf32>
    %55 = vector.broadcast %54 : vector<8x8x1xf32> to vector<8x8x8xf32>
    %56 = arith.mulf %51, %55 : vector<8x8x8xf32>
    %57 = arith.truncf %56 : vector<8x8x8xf32> to vector<8x8x8xbf16>
    %cst_16 = arith.constant dense<0.000000e+00> : vector<8x8x8xf32>
    %58 = tpu.matmul %57, %42, %cst_16 {dimension_numbers = #tpu.dot_dimension_numbers<[2], [1], [1], [2], [0, 0, 0, 1, 1, 2], [0], [0]>} : vector<8x8x8xbf16>, vector<8x8x8xbf16>, vector<8x8x8xf32> -> vector<8x8x8xf32>
    %59 = vector.extract_strided_slice %58 {offsets = [0, 0, 0], sizes = [2, 8, 8], strides = [1, 1, 1]} : vector<8x8x8xf32> to vector<2x8x8xf32>
    %60 = vector.shape_cast %59 : vector<2x8x8xf32> to vector<16x8xf32>
    %61 = vector.extract_strided_slice %58 {offsets = [2, 0, 0], sizes = [2, 8, 8], strides = [1, 1, 1]} : vector<8x8x8xf32> to vector<2x8x8xf32>
    %62 = vector.shape_cast %61 : vector<2x8x8xf32> to vector<16x8xf32>
    %63 = vector.extract_strided_slice %58 {offsets = [4, 0, 0], sizes = [2, 8, 8], strides = [1, 1, 1]} : vector<8x8x8xf32> to vector<2x8x8xf32>
    %64 = vector.shape_cast %63 : vector<2x8x8xf32> to vector<16x8xf32>
    %65 = vector.extract_strided_slice %58 {offsets = [6, 0, 0], sizes = [2, 8, 8], strides = [1, 1, 1]} : vector<8x8x8xf32> to vector<2x8x8xf32>
    %66 = vector.shape_cast %65 : vector<2x8x8xf32> to vector<16x8xf32>
    %67 = tpu.concatenate %60, %62, %64, %66 in 1 : vector<16x8xf32>, vector<16x8xf32>, vector<16x8xf32>, vector<16x8xf32> -> vector<16x32xf32>
    %68 = arith.truncf %67 : vector<16x32xf32> to vector<16x32xbf16>
    %c0_17 = arith.constant 0 : index
    %c0_18 = arith.constant 0 : index
    %c0_19 = arith.constant 0 : index
    %69 = vector.load %arg8[%c0_17, %c0_18, %c0_19] : memref<1x32x32xbf16, #tpu.memory_space<vmem>>, vector<1x32x32xbf16>
    %70 = vector.shape_cast %69 : vector<1x32x32xbf16> to vector<32x32xbf16>
    %c0_20 = arith.constant 0 : index
    %c0_21 = arith.constant 0 : index
    %c0_22 = arith.constant 0 : index
    %71 = vector.load %arg9[%c0_20, %c0_21, %c0_22] : memref<1x1x32xf32, #tpu.memory_space<vmem>>, vector<1x1x32xf32>
    %72 = vector.shape_cast %71 : vector<1x1x32xf32> to vector<1x32xf32>
    %cst_23 = arith.constant dense<0.000000e+00> : vector<16x32xf32>
    %73 = tpu.matmul %68, %70, %cst_23 {dimension_numbers = #tpu.dot_dimension_numbers<[1], [1], [0], [0], [0, 0, 1, 0], [], []>} : vector<16x32xbf16>, vector<32x32xbf16>, vector<16x32xf32> -> vector<16x32xf32>
    %74 = vector.broadcast %72 : vector<1x32xf32> to vector<16x32xf32>
    %75 = arith.addf %73, %74 : vector<16x32xf32>
    %76 = arith.addf %4, %75 : vector<16x32xf32>
    %c0_24 = arith.constant 0 : index
    %c0_25 = arith.constant 0 : index
    %c0_26 = arith.constant 0 : index
    %77 = vector.load %arg10[%c0_24, %c0_25, %c0_26] : memref<1x1x32xf32, #tpu.memory_space<vmem>>, vector<1x1x32xf32>
    %78 = vector.shape_cast %77 : vector<1x1x32xf32> to vector<1x32xf32>
    %c0_27 = arith.constant 0 : index
    %c0_28 = arith.constant 0 : index
    %c0_29 = arith.constant 0 : index
    %79 = vector.load %arg11[%c0_27, %c0_28, %c0_29] : memref<1x1x32xf32, #tpu.memory_space<vmem>>, vector<1x1x32xf32>
    %80 = vector.shape_cast %79 : vector<1x1x32xf32> to vector<1x32xf32>
    %cst_30 = arith.constant dense<0.000000e+00> : vector<16xf32>
    %81 = vector.multi_reduction <add>, %76, %cst_30 [1] : vector<16x32xf32> to vector<16xf32>
    %82 = vector.shape_cast %81 : vector<16xf32> to vector<16x1xf32>
    %cst_31 = arith.constant 3.200000e+01 : f32
    %83 = vector.broadcast %cst_31 : f32 to vector<16x1xf32>
    %84 = arith.divf %82, %83 : vector<16x1xf32>
    %85 = vector.broadcast %84 : vector<16x1xf32> to vector<16x32xf32>
    %86 = arith.subf %76, %85 : vector<16x32xf32>
    %87 = arith.mulf %86, %86 : vector<16x32xf32>
    %cst_32 = arith.constant dense<0.000000e+00> : vector<16xf32>
    %88 = vector.multi_reduction <add>, %87, %cst_32 [1] : vector<16x32xf32> to vector<16xf32>
    %89 = vector.shape_cast %88 : vector<16xf32> to vector<16x1xf32>
    %cst_33 = arith.constant 3.200000e+01 : f32
    %90 = vector.broadcast %cst_33 : f32 to vector<16x1xf32>
    %91 = arith.divf %89, %90 : vector<16x1xf32>
    %92 = vector.broadcast %84 : vector<16x1xf32> to vector<16x32xf32>
    %93 = arith.subf %76, %92 : vector<16x32xf32>
    %cst_34 = arith.constant 9.99999996E-13 : f32
    %94 = vector.broadcast %cst_34 : f32 to vector<16x1xf32>
    %95 = arith.addf %91, %94 : vector<16x1xf32>
    %96 = math.rsqrt %95 : vector<16x1xf32>
    %97 = vector.broadcast %96 : vector<16x1xf32> to vector<16x32xf32>
    %98 = arith.mulf %93, %97 : vector<16x32xf32>
    %99 = vector.broadcast %78 : vector<1x32xf32> to vector<16x32xf32>
    %100 = arith.mulf %98, %99 : vector<16x32xf32>
    %101 = vector.broadcast %80 : vector<1x32xf32> to vector<16x32xf32>
    %102 = arith.addf %100, %101 : vector<16x32xf32>
    %103 = arith.truncf %102 : vector<16x32xf32> to vector<16x32xbf16>
    %c0_35 = arith.constant 0 : index
    %c0_36 = arith.constant 0 : index
    %c0_37 = arith.constant 0 : index
    %104 = vector.load %arg12[%c0_35, %c0_36, %c0_37] : memref<1x128x32xbf16, #tpu.memory_space<vmem>>, vector<1x128x32xbf16>
    %105 = vector.shape_cast %104 : vector<1x128x32xbf16> to vector<128x32xbf16>
    %c0_38 = arith.constant 0 : index
    %c0_39 = arith.constant 0 : index
    %c0_40 = arith.constant 0 : index
    %106 = vector.load %arg13[%c0_38, %c0_39, %c0_40] : memref<1x1x128xf32, #tpu.memory_space<vmem>>, vector<1x1x128xf32>
    %107 = vector.shape_cast %106 : vector<1x1x128xf32> to vector<1x128xf32>
    %cst_41 = arith.constant dense<0.000000e+00> : vector<16x128xf32>
    %108 = tpu.matmul %103, %105, %cst_41 {dimension_numbers = #tpu.dot_dimension_numbers<[1], [1], [0], [0], [0, 0, 1, 0], [], []>} : vector<16x32xbf16>, vector<128x32xbf16>, vector<16x128xf32> -> vector<16x128xf32>
    %109 = vector.broadcast %107 : vector<1x128xf32> to vector<16x128xf32>
    %110 = arith.addf %108, %109 : vector<16x128xf32>
    %cst_42 = arith.constant 5.000000e-01 : f32
    %111 = vector.broadcast %cst_42 : f32 to vector<16x128xf32>
    %112 = arith.mulf %111, %110 : vector<16x128xf32>
    %cst_43 = arith.constant 4.471500e-02 : f32
    %113 = vector.broadcast %cst_43 : f32 to vector<16x128xf32>
    %114 = arith.mulf %113, %110 : vector<16x128xf32>
    %115 = arith.mulf %114, %110 : vector<16x128xf32>
    %116 = arith.mulf %115, %110 : vector<16x128xf32>
    %117 = arith.addf %110, %116 : vector<16x128xf32>
    %cst_44 = arith.constant 0.797884583 : f32
    %118 = vector.broadcast %cst_44 : f32 to vector<16x128xf32>
    %119 = arith.mulf %118, %117 : vector<16x128xf32>
    %120 = math.tanh %119 : vector<16x128xf32>
    %cst_45 = arith.constant 1.000000e+00 : f32
    %121 = vector.broadcast %cst_45 : f32 to vector<16x128xf32>
    %122 = arith.addf %121, %120 : vector<16x128xf32>
    %123 = arith.mulf %112, %122 : vector<16x128xf32>
    %124 = arith.truncf %123 : vector<16x128xf32> to vector<16x128xbf16>
    %c0_46 = arith.constant 0 : index
    %c0_47 = arith.constant 0 : index
    %c0_48 = arith.constant 0 : index
    %125 = vector.load %arg14[%c0_46, %c0_47, %c0_48] : memref<1x32x128xbf16, #tpu.memory_space<vmem>>, vector<1x32x128xbf16>
    %126 = vector.shape_cast %125 : vector<1x32x128xbf16> to vector<32x128xbf16>
    %c0_49 = arith.constant 0 : index
    %c0_50 = arith.constant 0 : index
    %c0_51 = arith.constant 0 : index
    %127 = vector.load %arg15[%c0_49, %c0_50, %c0_51] : memref<1x1x32xf32, #tpu.memory_space<vmem>>, vector<1x1x32xf32>
    %128 = vector.shape_cast %127 : vector<1x1x32xf32> to vector<1x32xf32>
    %cst_52 = arith.constant dense<0.000000e+00> : vector<16x32xf32>
    %129 = tpu.matmul %124, %126, %cst_52 {dimension_numbers = #tpu.dot_dimension_numbers<[1], [1], [0], [0], [0, 0, 1, 0], [], []>} : vector<16x128xbf16>, vector<32x128xbf16>, vector<16x32xf32> -> vector<16x32xf32>
    %130 = vector.broadcast %128 : vector<1x32xf32> to vector<16x32xf32>
    %131 = arith.addf %129, %130 : vector<16x32xf32>
    %132 = arith.addf %102, %131 : vector<16x32xf32>
    %c0_53 = arith.constant 0 : index
    %c0_54 = arith.constant 0 : index
    %c0_55 = arith.constant 0 : index
    %133 = vector.load %arg16[%c0_53, %c0_54, %c0_55] : memref<1x1x32xf32, #tpu.memory_space<vmem>>, vector<1x1x32xf32>
    %134 = vector.shape_cast %133 : vector<1x1x32xf32> to vector<1x32xf32>
    %c0_56 = arith.constant 0 : index
    %c0_57 = arith.constant 0 : index
    %c0_58 = arith.constant 0 : index
    %135 = vector.load %arg17[%c0_56, %c0_57, %c0_58] : memref<1x1x32xf32, #tpu.memory_space<vmem>>, vector<1x1x32xf32>
    %136 = vector.shape_cast %135 : vector<1x1x32xf32> to vector<1x32xf32>
    %cst_59 = arith.constant dense<0.000000e+00> : vector<16xf32>
    %137 = vector.multi_reduction <add>, %132, %cst_59 [1] : vector<16x32xf32> to vector<16xf32>
    %138 = vector.shape_cast %137 : vector<16xf32> to vector<16x1xf32>
    %cst_60 = arith.constant 3.200000e+01 : f32
    %139 = vector.broadcast %cst_60 : f32 to vector<16x1xf32>
    %140 = arith.divf %138, %139 : vector<16x1xf32>
    %141 = vector.broadcast %140 : vector<16x1xf32> to vector<16x32xf32>
    %142 = arith.subf %132, %141 : vector<16x32xf32>
    %143 = arith.mulf %142, %142 : vector<16x32xf32>
    %cst_61 = arith.constant dense<0.000000e+00> : vector<16xf32>
    %144 = vector.multi_reduction <add>, %143, %cst_61 [1] : vector<16x32xf32> to vector<16xf32>
    %145 = vector.shape_cast %144 : vector<16xf32> to vector<16x1xf32>
    %cst_62 = arith.constant 3.200000e+01 : f32
    %146 = vector.broadcast %cst_62 : f32 to vector<16x1xf32>
    %147 = arith.divf %145, %146 : vector<16x1xf32>
    %148 = vector.broadcast %140 : vector<16x1xf32> to vector<16x32xf32>
    %149 = arith.subf %132, %148 : vector<16x32xf32>
    %cst_63 = arith.constant 9.99999996E-13 : f32
    %150 = vector.broadcast %cst_63 : f32 to vector<16x1xf32>
    %151 = arith.addf %147, %150 : vector<16x1xf32>
    %152 = math.rsqrt %151 : vector<16x1xf32>
    %153 = vector.broadcast %152 : vector<16x1xf32> to vector<16x32xf32>
    %154 = arith.mulf %149, %153 : vector<16x32xf32>
    %155 = vector.broadcast %134 : vector<1x32xf32> to vector<16x32xf32>
    %156 = arith.mulf %154, %155 : vector<16x32xf32>
    %157 = vector.broadcast %136 : vector<1x32xf32> to vector<16x32xf32>
    %158 = arith.addf %156, %157 : vector<16x32xf32>
    %159 = vector.broadcast %0 : vector<16x1xf32> to vector<16x32xf32>
    %160 = arith.mulf %158, %159 : vector<16x32xf32>
    %c0_64 = arith.constant 0 : index
    %c0_65 = arith.constant 0 : index
    %161 = vector.load %arg23[%c0_64, %c0_65] : memref<16x32xf32, #tpu.memory_space<vmem>>, vector<16x32xf32>
    tpu.vector_store %arg23[%c0_64, %c0_65], %160 {strides = array<i32>} : memref<16x32xf32, #tpu.memory_space<vmem>>, vector<16x32xf32>,
    %c1_i32 = arith.constant 1 : i32
    %162 = arith.cmpi eq, %arg0, %c1_i32 : i32
    %163 = arith.extui %162 : i1 to i32
    %c0_i32_66 = arith.constant 0 : i32
    %164 = arith.cmpi ne, %163, %c0_i32_66 : i32
    scf.if %164 {
      %165 = vector.extract_strided_slice %160 {offsets = [0, 0], sizes = [1, 32], strides = [1, 1]} : vector<16x32xf32> to vector<1x32xf32>
      %166 = vector.extract_strided_slice %160 {offsets = [8, 0], sizes = [1, 32], strides = [1, 1]} : vector<16x32xf32> to vector<1x32xf32>
      %167 = tpu.concatenate %165, %166 in 0 : vector<1x32xf32>, vector<1x32xf32> -> vector<2x32xf32>
      %168 = arith.truncf %167 : vector<2x32xf32> to vector<2x32xbf16>
      %c0_67 = arith.constant 0 : index
      %c0_68 = arith.constant 0 : index
      %169 = vector.load %arg18[%c0_67, %c0_68] : memref<3x32xbf16, #tpu.memory_space<vmem>>, vector<3x32xbf16>
      %c0_69 = arith.constant 0 : index
      %c0_70 = arith.constant 0 : index
      %170 = vector.load %arg19[%c0_69, %c0_70] : memref<1x3xf32, #tpu.memory_space<vmem>>, vector<1x3xf32>
      %cst_71 = arith.constant dense<0.000000e+00> : vector<2x3xf32>
      %171 = tpu.matmul %168, %169, %cst_71 {dimension_numbers = #tpu.dot_dimension_numbers<[1], [1], [0], [0], [0, 0, 1, 0], [], []>} : vector<2x32xbf16>, vector<3x32xbf16>, vector<2x3xf32> -> vector<2x3xf32>
      %172 = vector.broadcast %170 : vector<1x3xf32> to vector<2x3xf32>
      %173 = arith.addf %171, %172 : vector<2x3xf32>
      %cst_72 = arith.constant dense<0xFF800000> : vector<2xf32>
      %174 = vector.multi_reduction <maximumf>, %173, %cst_72 [1] : vector<2x3xf32> to vector<2xf32>
      %175 = vector.shape_cast %174 : vector<2xf32> to vector<2x1xf32>
      %176 = vector.broadcast %175 : vector<2x1xf32> to vector<2x3xf32>
      %177 = arith.subf %173, %176 : vector<2x3xf32>
      %178 = math.exp %177 : vector<2x3xf32>
      %cst_73 = arith.constant dense<0.000000e+00> : vector<2xf32>
      %179 = vector.multi_reduction <add>, %178, %cst_73 [1] : vector<2x3xf32> to vector<2xf32>
      %180 = vector.shape_cast %179 : vector<2xf32> to vector<2x1xf32>
      %181 = math.log %180 : vector<2x1xf32>
      %c0_74 = arith.constant 0 : index
      %c0_75 = arith.constant 0 : index
      %182 = vector.load %arg20[%c0_74, %c0_75] : memref<2x3xf32, #tpu.memory_space<vmem>>, vector<2x3xf32>
      %183 = vector.broadcast %181 : vector<2x1xf32> to vector<2x3xf32>
      %184 = arith.subf %177, %183 : vector<2x3xf32>
      %185 = arith.mulf %182, %184 : vector<2x3xf32>
      %cst_76 = arith.constant dense<0.000000e+00> : vector<2xf32>
      %186 = vector.multi_reduction <add>, %185, %cst_76 [1] : vector<2x3xf32> to vector<2xf32>
      %187 = vector.shape_cast %186 : vector<2xf32> to vector<2x1xf32>
      %cst_77 = arith.constant 0.000000e+00 : f32
      %188 = vector.broadcast %cst_77 : f32 to vector<2x1xf32>
      %189 = arith.subf %188, %187 : vector<2x1xf32>
      %c0_78 = arith.constant 0 : index
      %c0_79 = arith.constant 0 : index
      %190 = vector.load %arg22[%c0_78, %c0_79] : memref<2x1xf32, #tpu.memory_space<vmem>>, vector<2x1xf32>
      tpu.vector_store %arg22[%c0_78, %c0_79], %189 {strides = array<i32>} : memref<2x1xf32, #tpu.memory_space<vmem>>, vector<2x1xf32>,
      %c0_80 = arith.constant 0 : index
      %c0_81 = arith.constant 0 : index
      %191 = vector.load %arg21[%c0_80, %c0_81] : memref<2x3xf32, #tpu.memory_space<vmem>>, vector<2x3xf32>
      tpu.vector_store %arg21[%c0_80, %c0_81], %173 {strides = array<i32>} : memref<2x3xf32, #tpu.memory_space<vmem>>, vector<2x3xf32>,
    } else {
    }
    return
  }
  func.func @transform_0(%arg0: i32) -> (i32, i32) {
    %c0_i32 = arith.constant 0 : i32
    %c0_i32_0 = arith.constant 0 : i32
    %c0_i32_1 = arith.constant 0 : i32
    return %c0_i32, %c0_i32_0 : i32, i32
  }
  func.func @transform_1(%arg0: i32) -> (i32, i32) {
    %c0_i32 = arith.constant 0 : i32
    %c0_i32_0 = arith.constant 0 : i32
    %c0_i32_1 = arith.constant 0 : i32
    return %c0_i32, %c0_i32_0 : i32, i32
  }
  func.func @transform_2(%arg0: i32) -> (i32, i32, i32) {
    %c0_i32 = arith.constant 0 : i32
    %c0_i32_0 = arith.constant 0 : i32
    %c0_i32_1 = arith.constant 0 : i32
    %c0_i32_2 = arith.constant 0 : i32
    return %c0_i32, %c0_i32_0, %c0_i32_1 : i32, i32, i32
  }
  func.func @transform_3(%arg0: i32) -> (i32, i32) {
    %c0_i32 = arith.constant 0 : i32
    %c0_i32_0 = arith.constant 0 : i32
    %c0_i32_1 = arith.constant 0 : i32
    return %c0_i32, %c0_i32_0 : i32, i32
  }
  func.func @transform_4(%arg0: i32) -> (i32, i32) {
    %c0_i32 = arith.constant 0 : i32
    %c0_i32_0 = arith.constant 0 : i32
    %c0_i32_1 = arith.constant 0 : i32
    return %c0_i32, %c0_i32_0 : i32, i32
  }
  func.func @transform_5(%arg0: i32) -> (i32, i32, i32) {
    %c0_i32 = arith.constant 0 : i32
    %c0_i32_0 = arith.constant 0 : i32
    %c0_i32_1 = arith.constant 0 : i32
    return %arg0, %c0_i32, %c0_i32_0 : i32, i32, i32
  }
  func.func @transform_6(%arg0: i32) -> (i32, i32, i32) {
    %c0_i32 = arith.constant 0 : i32
    %c0_i32_0 = arith.constant 0 : i32
    %c0_i32_1 = arith.constant 0 : i32
    return %arg0, %c0_i32, %c0_i32_0 : i32, i32, i32
  }
  func.func @transform_7(%arg0: i32) -> (i32, i32, i32) {
    %c0_i32 = arith.constant 0 : i32
    %c0_i32_0 = arith.constant 0 : i32
    %c0_i32_1 = arith.constant 0 : i32
    return %arg0, %c0_i32, %c0_i32_0 : i32, i32, i32
  }
  func.func @transform_8(%arg0: i32) -> (i32, i32, i32) {
    %c0_i32 = arith.constant 0 : i32
    %c0_i32_0 = arith.constant 0 : i32
    %c0_i32_1 = arith.constant 0 : i32
    return %arg0, %c0_i32, %c0_i32_0 : i32, i32, i32
  }
  func.func @transform_9(%arg0: i32) -> (i32, i32, i32) {
    %c0_i32 = arith.constant 0 : i32
    %c0_i32_0 = arith.constant 0 : i32
    %c0_i32_1 = arith.constant 0 : i32
    return %arg0, %c0_i32, %c0_i32_0 : i32, i32, i32
  }
  func.func @transform_10(%arg0: i32) -> (i32, i32, i32) {
    %c0_i32 = arith.constant 0 : i32
    %c0_i32_0 = arith.constant 0 : i32
    %c0_i32_1 = arith.constant 0 : i32
    return %arg0, %c0_i32, %c0_i32_0 : i32, i32, i32
  }
  func.func @transform_11(%arg0: i32) -> (i32, i32, i32) {
    %c0_i32 = arith.constant 0 : i32
    %c0_i32_0 = arith.constant 0 : i32
    %c0_i32_1 = arith.constant 0 : i32
    return %arg0, %c0_i32, %c0_i32_0 : i32, i32, i32
  }
  func.func @transform_12(%arg0: i32) -> (i32, i32, i32) {
    %c0_i32 = arith.constant 0 : i32
    %c0_i32_0 = arith.constant 0 : i32
    %c0_i32_1 = arith.constant 0 : i32
    return %arg0, %c0_i32, %c0_i32_0 : i32, i32, i32
  }
  func.func @transform_13(%arg0: i32) -> (i32, i32, i32) {
    %c0_i32 = arith.constant 0 : i32
    %c0_i32_0 = arith.constant 0 : i32
    %c0_i32_1 = arith.constant 0 : i32
    return %arg0, %c0_i32, %c0_i32_0 : i32, i32, i32
  }
  func.func @transform_14(%arg0: i32) -> (i32, i32, i32) {
    %c0_i32 = arith.constant 0 : i32
    %c0_i32_0 = arith.constant 0 : i32
    %c0_i32_1 = arith.constant 0 : i32
    return %arg0, %c0_i32, %c0_i32_0 : i32, i32, i32
  }
  func.func @transform_15(%arg0: i32) -> (i32, i32, i32) {
    %c0_i32 = arith.constant 0 : i32
    %c0_i32_0 = arith.constant 0 : i32
    %c0_i32_1 = arith.constant 0 : i32
    return %arg0, %c0_i32, %c0_i32_0 : i32, i32, i32
  }
  func.func @transform_16(%arg0: i32) -> (i32, i32, i32) {
    %c0_i32 = arith.constant 0 : i32
    %c0_i32_0 = arith.constant 0 : i32
    %c0_i32_1 = arith.constant 0 : i32
    return %arg0, %c0_i32, %c0_i32_0 : i32, i32, i32
  }
  func.func @transform_17(%arg0: i32) -> (i32, i32) {
    %c0_i32 = arith.constant 0 : i32
    %c0_i32_0 = arith.constant 0 : i32
    %c0_i32_1 = arith.constant 0 : i32
    return %c0_i32, %c0_i32_0 : i32, i32
  }
  func.func @transform_18(%arg0: i32) -> (i32, i32) {
    %c0_i32 = arith.constant 0 : i32
    %c0_i32_0 = arith.constant 0 : i32
    %c0_i32_1 = arith.constant 0 : i32
    return %c0_i32, %c0_i32_0 : i32, i32
  }
  func.func @transform_19(%arg0: i32) -> (i32, i32) {
    %c0_i32 = arith.constant 0 : i32
    %c0_i32_0 = arith.constant 0 : i32
    %c0_i32_1 = arith.constant 0 : i32
    return %c0_i32, %c0_i32_0 : i32, i32
  }
  func.func @transform_20(%arg0: i32) -> (i32, i32) {
    %c0_i32 = arith.constant 0 : i32
    %c0_i32_0 = arith.constant 0 : i32
    %c0_i32_1 = arith.constant 0 : i32
    return %c0_i32, %c0_i32_0 : i32, i32
  }
  func.func @transform_21(%arg0: i32) -> (i32, i32) {
    %c0_i32 = arith.constant 0 : i32
    %c0_i32_0 = arith.constant 0 : i32
    %c0_i32_1 = arith.constant 0 : i32
    return %c0_i32, %c0_i32_0 : i32, i32
  }
}

</mosaic_0001>

<bundles_post_ra>
// kernel: xlm_for_sequence_classification.1
= control target key start
LH: loop header
LB: loop body
LE: loop exit
PB: predicated region body
PF: predicated region fallthrough
CT: control target
= control target key end

     0   :  { %s3699_s0 = inlined_call_operand.vmem [shape: f32[16,32], index: 0, kind: input, shape index: {}]   ;;  %s3700_s1 = inlined_call_operand.vmem [shape: f32[16,1], index: 1, kind: input, shape index: {}]   ;;  %s3701_s2 = inlined_call_operand.vmem [shape: f32[8,1,8], index: 2, kind: input, shape index: {}]   ;;  %s3702_s3 = inlined_call_operand.vmem [shape: f32[1,32], index: 3, kind: input, shape index: {}]   ;;  %s3703_s4 = inlined_call_operand.vmem [shape: f32[1,32], index: 4, kind: input, shape index: {}]   ;;  %s3704_s5 = inlined_call_operand.vmem [shape: bf16[2,96,32], index: 5, kind: input, shape index: {}]   ;;  %s3705_s6 = inlined_call_operand.vmem [shape: f32[2,1,96], index: 6, kind: input, shape index: {}]   ;;  %s3706_s7 = inlined_call_operand.vmem [shape: bf16[2,32,32], index: 7, kind: input, shape index: {}]   ;;  %s3707_s8 = inlined_call_operand.vmem [shape: f32[2,1,32], index: 8, kind: input, shape index: {}]   ;;  %s3708_s9 = inlined_call_operand.vmem [shape: f32[2,1,32], index: 9, kind: input, shape index: {}]   ;;  %s3709_s10 = inlined_call_operand.vmem [shape: f32[2,1,32], index: 10, kind: input, shape index: {}]   ;;  %s3710_s11 = inlined_call_operand.vmem [shape: bf16[2,128,32], index: 11, kind: input, shape index: {}]   ;;  %s3711_s12 = inlined_call_operand.vmem [shape: f32[2,1,128], index: 12, kind: input, shape index: {}]   ;;  %s3712_s13 = inlined_call_operand.vmem [shape: bf16[2,32,128], index: 13, kind: input, shape index: {}]   ;;  %s3713_s14 = inlined_call_operand.vmem [shape: f32[2,1,32], index: 14, kind: input, shape index: {}]   ;;  %s3714_s15 = inlined_call_operand.vmem [shape: f32[2,1,32], index: 15, kind: input, shape index: {}]   ;;  %s3715_s16 = inlined_call_operand.vmem [shape: f32[2,1,32], index: 16, kind: input, shape index: {}]   ;;  %s3716_s17 = inlined_call_operand.vmem [shape: bf16[3,32], index: 17, kind: input, shape index: {}]   ;;  %s3717_s18 = inlined_call_operand.vmem [shape: f32[1,3], index: 18, kind: input, shape index: {}]   ;;  %s3718_s19 = inlined_call_operand.vmem [shape: f32[2,3], index: 19, kind: input, shape index: {}]   ;;  %s3719_s20 = inlined_call_operand.hbm [shape: f32[2,3], index: 20, kind: output, shape index: {0}]   ;;  %s3720_s21 = inlined_call_operand.vmem [shape: f32[2,1], index: 21, kind: output, shape index: {1}]  }
   0x1   :  { %3727 = sst [smem:[#allocation7_spill]] %s3699_s0 }
   0x2   :  { %3728 = sst [smem:[#allocation8_spill]] %s3700_s1 }
   0x3   :  { %3729 = sst [smem:[#allocation9_spill]] %s3701_s2 }
   0x4   :  { %3730 = sst [smem:[#allocation10_spill]] %s3702_s3 }
   0x5   :  { %3731 = sst [smem:[#allocation11_spill]] %s3703_s4 }
   0x6   :  { %3732 = sst [smem:[#allocation12_spill]] %s3704_s5 }
   0x7   :  { %3733 = sst [smem:[#allocation13_spill]] %s3706_s7 }
   0x8   :  { %3734 = sst [smem:[#allocation14_spill]] %s3716_s17 }
   0x9   :  { %3735 = sst [smem:[#allocation15_spill]] %s3717_s18 }
   0xa   :  { %3736 = sst [smem:[#allocation16_spill]] %s3718_s19 }
   0xb   :  { %3737 = sst [smem:[#allocation17_spill]] %s3719_s20 }
   0xc   :  { %3738 = sst [smem:[#allocation18_spill]] %s3720_s21 }
   0xd   :  { %27 = vsyncpa [#allocation4], 0  ;;  %s3201_s2 = smov 0  }
   0xe LB: > { %3739 = sst [smem:[#allocation6_spill]] %s3074_s2  ;;  %s3207_s25 = sadd.s32 4294967295, %s3074_s2   ;;  %s3074_s2 = sphi %s3201_s2, %s33_s2  }
   0xf   : > { %p2630_p0 = scmp.ge.s32.totalorder %s3074_s2, 1  ;;  %p675_p1 = scmp.lt.s32.totalorder %s3074_s2, 3 }
  0x11   : > { %p676_p2 = pnand %p2630_p0, %p675_p1 }
  0x12   : > { %p769_p3 = scmp.lt.s32.totalorder (!%p676_p2), %s3207_s25, 1  ;;  %s3740_s3 = sld [smem:[#allocation8_spill]] (!%p676_p2) }
  0x13   : > { %679 = sbr.rel (%p676_p2) target bundleno = 3815 (0xee7), region = 100  ;;  %s3741_s29 = sld [smem:[#allocation12_spill]] (!%p676_p2) }
  0x14   : > { %s3742_s7 = sld [smem:[#allocation13_spill]] (!%p676_p2)  ;;  %p2638_p4 = scmp.ne.s32.totalorder (!%p676_p2), %s3207_s25, 0 }
  0x18   : > { %v3215_v0 = vld [vmem:[%s3740_s3] sm:$0xff] (!%p676_p2)  ;;  %v3220_v1 = vld [vmem:[%s3740_s3 + $0x8] sm:$0xff] (!%p676_p2) }
  0x1a   : > { %s3223_s0 = scalar_select %p769_p3, %s3207_s25, 1 }
  0x1b   : > { %819 = sbr.rel (%p2638_p4) target bundleno = 354 (0x162), region = 104  ;;  %s3743_s28 = sld [smem:[#allocation7_spill]] (!%p2638_p4)  ;;  %vm824_vm0 = vcmask (!%p2638_p4), 261120   ;;  %v3076_v6 = vmov (!%p2638_p4), 0  }
  0x1c   : > { %s2914_s4 = smul.u32 48, %s3223_s0  ;;  %s2701_s23 = sshll.u32 %s3223_s0, 4  ;;  %2944 = vset.pattern.permute.xlu0 (!%p2638_p4), %v3076_v6  ;;  %2945 = vset.pattern.permute.xlu1 (!%p2638_p4), %v3076_v6 }
  0x1d   : > { %s3243_s21 = scalar_lea.vmem %s3742_s7, %s2701_s23  ;;  %s2702_s1 = sshll.u32 %s3223_s0, 6 }
  0x1e   : > { %s3238_s3 = scalar_lea.vmem %s3741_s29, %s2914_s4  ;;  %s3261_s29 = scalar_lea.vmem %s3710_s11, %s2702_s1 }
  0x1f   : > { %s3266_s7 = scalar_lea.vmem %s3712_s13, %s2701_s23  ;;  %s806_s22 = scalar_lea.vmem %s3713_s14, %s3223_s0 }
  0x20   : > { %s809_s30 = scalar_lea.vmem %s3714_s15, %s3223_s0  ;;  %s812_s27 = scalar_lea.vmem %s3715_s16, %s3223_s0 }
  0x21   : > { %v820_v2 = vld [vmem:[%s3743_s28] sm:$0xff] (!%p2638_p4)  ;;  %v821_v3 = vld [vmem:[%s3743_s28 + $0x8] sm:$0xff] (!%p2638_p4)  ;;  %s3744_s18 = sld [smem:[#allocation10_spill]] (!%p2638_p4)  ;;  %s3745_s26 = sld [smem:[#allocation11_spill]] (!%p2638_p4) }
  0x22   : > { %v825_v4 = vsel %vm824_vm0, %v820_v2, 0.0  ;;  %v828_v5 = vsel %vm824_vm0, %v821_v3, 0.0 }
  0x23   : > { %826 = vadd.xlane.f32.xlu0 %v825_v4 }
  0x27   : > { %829 = vadd.xlane.f32.xlu0 %v828_v5  ;;  %v2639_v24 = vld [vmem:[%s3744_s18] ss:$0 sm:$0xff] }
  0x28   : > { %v2640_v26 = vld [vmem:[%s3745_s26] ss:$0 sm:$0xff] }
  0x3d   : > { %870 = vperm.xlu0 %2944, %v3215_v0  }
  0xb0   : > { %v827_v7 = vpop.xlane.xlu0 %826 }
  0xb1   : > { %v832_v8 = vmul.f32 0.03125, %v827_v7 }
  0xb3   : > { %v834_v9 = vsub.f32 %v820_v2, %v832_v8 }
  0xb4   : > { %v830_v10 = vpop.xlane.xlu0 %829 }
  0xb5   : > { %v833_v11 = vmul.f32 0.03125, %v830_v10  ;;  %v836_v12 = vmul.f32 %v834_v9, %v834_v9 }
  0xb7   : > { %v835_v13 = vsub.f32 %v821_v3, %v833_v11  ;;  %v838_v14 = vsel %vm824_vm0, %v836_v12, 0.0 }
  0xb8   : > { %839 = vadd.xlane.f32.xlu1 %v838_v14 }
  0xb9   : > { %v837_v15 = vmul.f32 %v835_v13, %v835_v13 }
  0xbb   : > { %v841_v16 = vsel %vm824_vm0, %v837_v15, 0.0 }
  0xbc   : > { %842 = vadd.xlane.f32.xlu1 %v841_v16  ;;  %v871_v29 = vpop.permute.xlu0 %870 }
  0xcd   : > { %875 = vperm.xlu1 %2945, %v3220_v1  }
 0x145   : > { %v840_v17 = vpop.xlane.xlu1 %839 }
 0x146   : > { %v844_v18 = vmul.f32 0.03125, %v840_v17 }
 0x148   : > { %v846_v19 = vadd.f32 1e-12, %v844_v18 }
 0x149   : > { %v843_v20 = vpop.xlane.xlu1 %842 }
 0x14a   : > { %2946 = vrsqrt.f32 %v846_v19  ;;  %v845_v21 = vmul.f32 0.03125, %v843_v20 }
 0x14c   : > { %v847_v22 = vadd.f32 1e-12, %v845_v21 }
 0x14d   : > { %v876_v34 = vpop.permute.xlu1 %875 }
 0x14e   : > { %2948 = vrsqrt.f32 %v847_v22 }
 0x154   : > { %v2947_v23 = vpop.eup %2946 }
 0x155   : > { %v850_v25 = vmul.f32 %v2947_v23, %v834_v9 }
 0x157   : > { %v858_v27 = vmul.f32 %v2639_v24, %v850_v25 }
 0x158   : > { %v2949_v28 = vpop.eup %2948 }
 0x159   : > { %v866_v30 = vadd.f32 %v2640_v26, %v858_v27  ;;  %v851_v31 = vmul.f32 %v2949_v28, %v835_v13 }
 0x15b   : > { %v878_v32 = vmul.f32 %v871_v29, %v866_v30  ;;  %v859_v33 = vmul.f32 %v2639_v24, %v851_v31 }
 0x15d   : > { %880 = vst.msk [vmem:[#allocation2] sm:$0xff] %vm824_vm0, %v878_v32  ;;  %v867_v35 = vadd.f32 %v2640_v26, %v859_v33 }
 0x15f   : > { %v879_v36 = vmul.f32 %v876_v34, %v867_v35 }
 0x161   : > { %881 = vst.msk [vmem:[#allocation2 + $0x8] sm:$0xff] %vm824_vm0, %v879_v36 }
 0x162 PF: > { %v2972_v37 = vld [vmem:[%s3238_s3] sm:$0xff]   ;;  %v3077_v38 = vmov 0.0   ;;  %vm934_vm1 = vcmask 261120   ;;  %v2973_v40 = vld [vmem:[%s3238_s3 + $0x8] sm:$0xff]   ;;  %vm3078_vm2 = vmmov 0   ;;  %v2974_v42 = vld [vmem:[%s3238_s3 + $0x10] sm:$0xff]   ;;  %s3750_s24 = scalar_lea.vmem %s3709_s10, %s3223_s0 }
 0x163   : > { %2760 = vmatprep.subr.bf16.mxu0 %v3077_v38  ;;  %2788 = vmatprep.subr.bf16.mxu1 %v3077_v38  ;;  %v939_v39 = vsel %vm934_vm1, %v2972_v37, 0  ;;  %v942_v41 = vsel %vm934_vm1, %v2973_v40, 0  ;;  %v945_v43 = vsel %vm934_vm1, %v2974_v42, 0  ;;  %v2975_v44 = vld [vmem:[%s3238_s3 + $0x18] sm:$0xff]   ;;  %v2976_v46 = vld [vmem:[%s3238_s3 + $0x20] sm:$0xff]   ;;  %v2977_v48 = vld [vmem:[%s3238_s3 + $0x28] sm:$0xff]   ;;  %s3746_s3 = scalar_lea.vmem %s3705_s6, %s3223_s0 }
 0x164   : > { %2761 = vmatpush3.bf16.xpose.msra.mxu0 %v939_v39  ;;  %2772 = vmatprep.mubr.msk.bf16.mxu0 %vm3078_vm2, %v3077_v38  ;;  %v948_v45 = vsel %vm934_vm1, %v2975_v44, 0  ;;  %v951_v47 = vsel %vm934_vm1, %v2976_v46, 0  ;;  %v954_v49 = vsel %vm934_vm1, %v2977_v48, 0  ;;  %v3324_v50 = vld [vmem:[#allocation2] sm:$0xff]  ;;  %s3079_s4 = smov 112   ;;  %s3080_s23 = smov 120  }
 0x165   : > { %2762 = vmatprep.subr.bf16.mxu0 %v3077_v38  ;;  %2790 = vmatprep.mubr.msk.bf16.mxu1 %vm3078_vm2, %v3077_v38  ;;  %v2641_v53 = vld [vmem:[%s3746_s3] ss:$0 sm:$0xff]  ;;  %s3081_s20 = smov 96   ;;  %s3082_s17 = smov 104   ;;  %vm1084_vm3 = vcmask 64512   ;;  %vm1575_vm4 = vcmask 1043456  }
 0x166   : > { %s3747_s19 = sld [smem:[#allocation9_spill]]  ;;  %s3083_s18 = smov 64   ;;  %vm1981_vm5 = vcmask 130048   ;;  %vm1984_vm6 = vcmask 195584  }
 0x167   : > { %s3084_s3 = smov 8   ;;  %p2694_p5 = scmp.ne.s32.totalorder %s3207_s25, 1 }
 0x168   : > { %v3326_v51 = vld [vmem:[#allocation2 + $0x8] sm:$0xff]  ;;  %vm2388_vm7 = vcmask (!%p2694_p5), 1040384   ;;  %vm3089_vm8 = vmmov (!%p2694_p5), 0   ;;  %vm2445_vm9 = vcmask (!%p2694_p5), 17408   ;;  %vm2464_vm10 = vcmask (!%p2694_p5), 1024  }
 0x169   : > { %v884_v52 = vpack.c.bf16 %v3326_v51, %v3324_v50 }
 0x16c   : > { %2763 = vmatpush3.bf16.xpose.msra.mxu0 %v942_v41  ;;  %v2649_v30 = vld [vmem:[%s3747_s19] ss:$0 sm:$0xff]  ;;  %v2650_v37 = vld [vmem:[%s3747_s19 + $0x1] ss:$0 sm:$0xff] }
 0x16d   : > { %2764 = vmatprep.subr.bf16.mxu0 %v3077_v38 }
 0x174   : > { %2765 = vmatpush3.bf16.xpose.msra.mxu0 %v945_v43 }
 0x175   : > { %2766 = vmatprep.subr.bf16.mxu0 %v3077_v38 }
 0x17c   : > { %2767 = vmatpush3.bf16.xpose.msra.mxu0 %v948_v45  ;;  %v2651_v45 = vld [vmem:[%s3747_s19 + $0x2] ss:$0 sm:$0xff] }
 0x17d   : > { %2768 = vmatprep.subr.bf16.mxu0 %v3077_v38 }
 0x184   : > { %2769 = vmatpush3.bf16.xpose.msra.mxu0 %v951_v47 }
 0x185   : > { %2770 = vmatprep.subr.bf16.mxu0 %v3077_v38 }
 0x18c   : > { %2771 = vmatpush3.bf16.xpose.msra.mxu0 %v954_v49 }
 0x18d   : > { %2776 = vmatprep.subr.bf16.mxu0 %v3077_v38 }
 0x193   : > { %2773 = vmatmul.mubr.msk.bf16.vlgmr.msra.gmra.mrb[0].mxu0 %vm934_vm1, %v884_v52 }
 0x194   : > { %2778 = vmatprep.mubr.msk.bf16.mxu0 %vm3078_vm2, %v3077_v38 }
 0x266   : > { %v990_v54 = vpop.f32.mrb[0].mxu0 }
 0x267   : > { %v991_v55 = vadd.f32 %v2641_v53, %v990_v54  ;;  %v2774_v56 = vpop.f32.mrb[1].mxu0  ;;  %v2652_v54 = vld [vmem:[%s3747_s19 + $0x3] ss:$0 sm:$0xff] }
 0x268   : > { %v993_v57 = vpop.f32.mrb[2].mxu0 }
 0x269   : > { %v994_v58 = vadd.f32 %v2641_v53, %v993_v57  ;;  %1005 = vrot.lane.b32.xlu1 %v991_v55, %s3079_s4  ;;  %999 = vrot.lane.b32.xlu0 %v991_v55, %s3080_s23  ;;  %v2775_v59 = vpop.f32.mrb[3].mxu0  ;;  %v3339_v61 = vpack.c.bf16 %v991_v55, %v991_v55 }
 0x26b   : > { %v2950_v60 = vpack.i.bf16 %v994_v58, %v991_v55  ;;  %v3342_v62 = vpack.c.bf16 %v994_v58, %v994_v58 }
 0x26d   : > { %1007 = vrot.lane.b32.xlu1 %v994_v58, %s3079_s4  ;;  %1001 = vrot.lane.b32.xlu0 %v994_v58, %s3080_s23  ;;  %s3085_s4 = smov 16  }
 0x271   : > { %1082 = vrot.lane.b32.xlu1 %v3339_v61, %s3081_s20  ;;  %2951 = vrot.lane.b32.xlu0 %v2950_v60, %s3082_s17  ;;  %s3748_s17 = scalar_lea.vmem %s3707_s8, %s3223_s0 }
 0x275   : > { %1132 = vrot.lane.b32.xlu1 %v3342_v62, %s3081_s20 }
 0x2db   : > { %v1006_v63 = vpop.permute.xlu1 %1005  ;;  %v1000_v2 = vpop.permute.xlu0 %999 }
 0x2dc   : > { %v3345_v3 = vpack.c.bf16 %v1006_v63, %v1006_v63  ;;  %v3347_v4 = vpack.c.bf16 %v1000_v2, %v1000_v2 }
 0x2de   : > { %1181 = vrot.lane.b32.xlu0 %v3347_v4, %s3081_s20  ;;  %1279 = vrot.lane.b32.xlu1 %v3345_v3, %s3081_s20 }
 0x2df   : > { %v1008_v5 = vpop.permute.xlu1 %1007  ;;  %v1002_v6 = vpop.permute.xlu0 %1001 }
 0x2e0   : > { %v3351_v7 = vpack.c.bf16 %v1002_v6, %v1002_v6  ;;  %v3354_v10 = vpack.c.bf16 %v1008_v5, %v1008_v5 }
 0x2e2   : > { %1230 = vrot.lane.b32.xlu0 %v3351_v7, %s3081_s20 }
 0x2e3   : > { %v1083_v8 = vpop.permute.xlu1 %1082  ;;  %v2952_v9 = vpop.permute.xlu0 %2951 }
 0x2e4   : > { %v1089_v11 = vsel %vm1084_vm3, %v1083_v8, 0  ;;  %v2954_v12 = vunpack.i.h.bf16 %v2952_v9  ;;  %v2953_v13 = vunpack.i.l.bf16 %v2952_v9  ;;  %v2653_v8 = vld [vmem:[%s3747_s19 + $0x4] ss:$0 sm:$0xff]  ;;  %v2655_v9 = vld [vmem:[%s3747_s19 + $0x6] ss:$0 sm:$0xff] }
 0x2e5   : > { %2777 = vmatpush3.bf16.xpose.msra.mxu0 %v1089_v11 }
 0x2e6   : > { %v3357_v14 = vpack.c.bf16 %v2953_v13, %v2953_v13  ;;  %1328 = vrot.lane.b32.xlu0 %v3354_v10, %s3081_s20  ;;  %2782 = vmatprep.subr.bf16.mxu0 %v3077_v38  ;;  %v3361_v15 = vpack.c.bf16 %v2954_v12, %v2954_v12 }
 0x2e7   : > { %v1133_v16 = vpop.permute.xlu1 %1132 }
 0x2e8   : > { %1377 = vrot.lane.b32.xlu1 %v3357_v14, %s3081_s20  ;;  %v1138_v17 = vsel %vm1084_vm3, %v1133_v16, 0 }
 0x2ea   : > { %1426 = vrot.lane.b32.xlu0 %v3361_v15, %s3081_s20 }
 0x2ec   : > { %2779 = vmatmul.mubr.msk.bf16.vlgmr.msra.gmra.mrb[4].mxu0 %vm1084_vm3, %v3339_v61 }
 0x2ed   : > { %2783 = vmatpush3.bf16.xpose.msra.mxu0 %v1138_v17  ;;  %2784 = vmatprep.mubr.msk.bf16.mxu0 %vm3078_vm2, %v3077_v38 }
 0x2ee   : > { %2812 = vmatprep.subr.bf16.mxu0 %v3077_v38 }
 0x2f4   : > { %2785 = vmatmul.mubr.msk.bf16.vlgmr.msra.gmra.mrb[8].mxu0 %vm1084_vm3, %v3342_v62 }
 0x2f5   : > { %2814 = vmatprep.mubr.msk.bf16.mxu0 %vm3078_vm2, %v3077_v38 }
 0x350   : > { %v1182_v18 = vpop.permute.xlu0 %1181  ;;  %v1280_v20 = vpop.permute.xlu1 %1279 }
 0x351   : > { %v1187_v19 = vsel %vm1084_vm3, %v1182_v18, 0  ;;  %v1285_v25 = vsel %vm1084_vm3, %v1280_v20, 0 }
 0x352   : > { %2789 = vmatpush3.bf16.xpose.msra.mxu1 %v1187_v19 }
 0x353   : > { %2794 = vmatprep.subr.bf16.mxu1 %v3077_v38 }
 0x354   : > { %v1231_v21 = vpop.permute.xlu0 %1230 }
 0x355   : > { %v1236_v22 = vsel %vm1084_vm3, %v1231_v21, 0 }
 0x358   : > { %v1329_v26 = vpop.permute.xlu0 %1328 }
 0x359   : > { %2791 = vmatmul.mubr.msk.bf16.vlgmr.msra.gmra.mrb[0].mxu1 %vm1084_vm3, %v3347_v4  ;;  %v1334_v27 = vsel %vm1084_vm3, %v1329_v26, 0 }
 0x35a   : > { %2795 = vmatpush3.bf16.xpose.msra.mxu1 %v1236_v22  ;;  %v1378_v23 = vpop.permute.xlu1 %1377  ;;  %2796 = vmatprep.mubr.msk.bf16.mxu1 %vm3078_vm2, %v3077_v38 }
 0x35b   : > { %v1383_v24 = vsel %vm1084_vm3, %v1378_v23, 0  ;;  %2800 = vmatprep.subr.bf16.mxu1 %v3077_v38 }
 0x35c   : > { %2813 = vmatpush3.bf16.xpose.msra.mxu0 %v1383_v24  ;;  %v1427_v28 = vpop.permute.xlu0 %1426 }
 0x35d   : > { %2824 = vmatprep.subr.bf16.mxu0 %v3077_v38  ;;  %v1432_v29 = vsel %vm1084_vm3, %v1427_v28, 0 }
 0x361   : > { %2797 = vmatmul.mubr.msk.bf16.vlgmr.msra.gmra.mrb[4].mxu1 %vm1084_vm3, %v3351_v7 }
 0x362   : > { %2801 = vmatpush3.bf16.xpose.msra.mxu1 %v1285_v25  ;;  %2802 = vmatprep.mubr.msk.bf16.mxu1 %vm3078_vm2, %v3077_v38 }
 0x363   : > { %2815 = vmatmul.mubr.msk.bf16.vlgmr.msra.gmra.mrb[12].mxu0 %vm1084_vm3, %v3357_v14  ;;  %2806 = vmatprep.subr.bf16.mxu1 %v3077_v38 }
 0x364   : > { %2826 = vmatprep.mubr.msk.bf16.mxu0 %vm3078_vm2, %v3077_v38 }
 0x369   : > { %2803 = vmatmul.mubr.msk.bf16.vlgmr.msra.gmra.mrb[8].mxu1 %vm1084_vm3, %v3345_v3 }
 0x36a   : > { %2807 = vmatpush3.bf16.xpose.msra.mxu1 %v1334_v27  ;;  %2808 = vmatprep.mubr.msk.bf16.mxu1 %vm3078_vm2, %v3077_v38 }
 0x36b   : > { %2818 = vmatprep.subr.bf16.mxu1 %v3077_v38 }
 0x371   : > { %2809 = vmatmul.mubr.msk.bf16.vlgmr.msra.gmra.mrb[12].mxu1 %vm1084_vm3, %v3354_v10 }
 0x372   : > { %2819 = vmatpush3.bf16.xpose.msra.mxu1 %v1432_v29  ;;  %2820 = vmatprep.mubr.msk.bf16.mxu1 %vm3078_vm2, %v3077_v38 }
 0x373   : > { %2830 = vmatprep.subr.bf16.mxu1 %v3077_v38 }
 0x379   : > { %2821 = vmatmul.mubr.msk.bf16.vlgmr.msra.gmra.mrb[16].mxu1 %vm1084_vm3, %v3361_v15 }
 0x37a   : > { %2832 = vmatprep.mubr.msk.bf16.mxu1 %vm3078_vm2, %v3077_v38 }
 0x3bf   : > { %v1125_v31 = vpop.f32.mrb[4].mxu0 }
 0x3c0   : > { %v3414_v32 = vadd.f32 %v2649_v30, %v1125_v31  ;;  %v2780_v33 = vpop.f32.mrb[5].mxu0  ;;  %v2654_v30 = vld [vmem:[%s3747_s19 + $0x5] ss:$0 sm:$0xff] }
 0x3c1   : > { %v1128_v34 = vpop.f32.mrb[6].mxu0 }
 0x3c2   : > { %v2781_v35 = vpop.f32.mrb[7].mxu0  ;;  %v1474_v36 = vsel %vm1084_vm3, %v3414_v32, -inf }
 0x3c3   : > { %1475 = vmax.xlane.f32.xlu1 %v1474_v36 }
 0x3c7   : > { %v1174_v39 = vpop.f32.mrb[8].mxu0 }
 0x3c8   : > { %v3421_v40 = vadd.f32 %v2650_v37, %v1174_v39  ;;  %v2786_v41 = vpop.f32.mrb[9].mxu0 }
 0x3c9   : > { %v1177_v42 = vpop.f32.mrb[10].mxu0 }
 0x3ca   : > { %v2787_v43 = vpop.f32.mrb[11].mxu0  ;;  %v1477_v44 = vsel %vm1084_vm3, %v3421_v40, -inf }
 0x3cb   : > { %1478 = vmax.xlane.f32.xlu0 %v1477_v44 }
 0x42c   : > { %v1223_v46 = vpop.f32.mrb[0].mxu1 }
 0x42d   : > { %v3428_v47 = vadd.f32 %v2651_v45, %v1223_v46  ;;  %v2792_v48 = vpop.f32.mrb[1].mxu1 }
 0x42e   : > { %v1226_v49 = vpop.f32.mrb[2].mxu1 }
 0x42f   : > { %v2793_v52 = vpop.f32.mrb[3].mxu1  ;;  %v1480_v53 = vsel %vm1084_vm3, %v3428_v47, -inf }
 0x430   : > { %1481 = vmax.xlane.f32.xlu0 %v1480_v53 }
 0x434   : > { %v1272_v55 = vpop.f32.mrb[4].mxu1 }
 0x435   : > { %v3435_v56 = vadd.f32 %v2652_v54, %v1272_v55  ;;  %v2798_v57 = vpop.f32.mrb[5].mxu1 }
 0x436   : > { %v1275_v58 = vpop.f32.mrb[6].mxu1  ;;  %v1419_v59 = vpop.f32.mrb[12].mxu0 }
 0x437   : > { %v2799_v60 = vpop.f32.mrb[7].mxu1  ;;  %v2816_v63 = vpop.f32.mrb[13].mxu0  ;;  %v1483_v2 = vsel %vm1084_vm3, %v3435_v56, -inf  ;;  %v3447_v17 = vadd.f32 %v2655_v9, %v1419_v59 }
 0x438   : > { %1484 = vmax.xlane.f32.xlu1 %v1483_v2  ;;  %v1422_v5 = vpop.f32.mrb[14].mxu0 }
 0x439   : > { %v2817_v6 = vpop.f32.mrb[15].mxu0  ;;  %v1492_v20 = vsel %vm1084_vm3, %v3447_v17, -inf }
 0x43c   : > { %v1321_v11 = vpop.f32.mrb[8].mxu1 }
 0x43d   : > { %v3445_v12 = vadd.f32 %v2653_v8, %v1321_v11  ;;  %v2804_v13 = vpop.f32.mrb[9].mxu1 }
 0x43e   : > { %v1324_v16 = vpop.f32.mrb[10].mxu1 }
 0x43f   : > { %v2805_v18 = vpop.f32.mrb[11].mxu1  ;;  %v1486_v19 = vsel %vm1084_vm3, %v3445_v12, -inf }
 0x440   : > { %1487 = vmax.xlane.f32.xlu0 %v1486_v19 }
 0x444   : > { %v1370_v21 = vpop.f32.mrb[12].mxu1  ;;  %1493 = vmax.xlane.f32.xlu0 %v1492_v20 }
 0x445   : > { %v2810_v22 = vpop.f32.mrb[13].mxu1  ;;  %v1371_v33 = vadd.f32 %v2654_v30, %v1370_v21 }
 0x446   : > { %v1373_v23 = vpop.f32.mrb[14].mxu1 }
 0x447   : > { %v2811_v24 = vpop.f32.mrb[15].mxu1 }
 0x449   : > { %1619 = vrot.lane.b32.xlu1 %v3342_v62, %s3083_s18  ;;  %v2656_v62 = vld [vmem:[%s3747_s19 + $0x7] ss:$0 sm:$0xff] }
 0x44c   : > { %v1468_v25 = vpop.f32.mrb[16].mxu1 }
 0x44d   : > { %v2822_v26 = vpop.f32.mrb[17].mxu1  ;;  %v3466_v35 = vadd.f32 %v2656_v62, %v1468_v25 }
 0x44e   : > { %v1471_v27 = vpop.f32.mrb[18].mxu1 }
 0x44f   : > { %v2823_v28 = vpop.f32.mrb[19].mxu1 }
 0x450   : > { %v1476_v29 = vpop.xlane.xlu1 %1475 }
 0x451   : > { %v1498_v31 = vsub.f32 %v3414_v32, %v1476_v29 }
 0x453   : > { %v1506_v34 = vmul.f32 1.442695, %v1498_v31 }
 0x455   : > { %2990 = vpow2.f32 %v1506_v34 }
 0x458   : > { %v1479_v37 = vpop.xlane.xlu0 %1478 }
 0x459   : > { %v1499_v39 = vsub.f32 %v3421_v40, %v1479_v37 }
 0x45a   : > { %1570 = vrot.lane.b32.xlu0 %v3339_v61, %s3083_s18  ;;  %v1489_v61 = vsel %vm1084_vm3, %v1371_v33, -inf }
 0x45b   : > { %v1508_v41 = vmul.f32 1.442695, %v1499_v39 }
 0x45d   : > { %2992 = vpow2.f32 %v1508_v41 }
 0x45e   : > { %1715 = vrot.lane.b32.xlu0 %v3351_v7, %s3083_s18  ;;  %v1495_v7 = vsel %vm1084_vm3, %v3466_v35, -inf }
 0x45f   : > { %v3471_v36 = vpop.eup %2990 }
 0x460   : > { %v1522_v32 = vsel %vm1084_vm3, %v3471_v36, 0.0 }
 0x467   : > { %v3478_v42 = vpop.eup %2992 }
 0x468   : > { %v1525_v43 = vsel %vm1084_vm3, %v3478_v42, 0.0 }
 0x46d   : > { %1490 = vmax.xlane.f32.xlu1 %v1489_v61 }
 0x471   : > { %1496 = vmax.xlane.f32.xlu1 %v1495_v7 }
 0x47d   : > { %1523 = vadd.xlane.f32.xlu0 %v1522_v32 }
 0x482   : > { %1667 = vrot.lane.b32.xlu1 %v3347_v4, %s3083_s18 }
 0x4a6   : > { %1526 = vadd.xlane.f32.xlu1 %v1525_v43 }
 0x4b7   : > { %1763 = vrot.lane.b32.xlu1 %v3345_v3, %s3083_s18 }
 0x4bd   : > { %v1482_v44 = vpop.xlane.xlu0 %1481 }
 0x4be   : > { %v1500_v45 = vsub.f32 %v3428_v47, %v1482_v44 }
 0x4c0   : > { %v1510_v46 = vmul.f32 1.442695, %v1500_v45 }
 0x4c2   : > { %2994 = vpow2.f32 %v1510_v46 }
 0x4c5   : > { %v1485_v4 = vpop.xlane.xlu1 %1484 }
 0x4c6   : > { %v1501_v48 = vsub.f32 %v3435_v56, %v1485_v4 }
 0x4c8   : > { %v1512_v40 = vmul.f32 1.442695, %v1501_v48 }
 0x4c9   : > { %v1620_v49 = vpop.permute.xlu1 %1619 }
 0x4ca   : > { %v1625_v52 = vsel %vm1575_vm4, %v1620_v49, 0  ;;  %2996 = vpow2.f32 %v1512_v40 }
 0x4cb   : > { %2831 = vmatpush3.bf16.msra.mxu1 %v1625_v52 }
 0x4cc   : > { %v3487_v53 = vpop.eup %2994  ;;  %2842 = vmatprep.subr.bf16.mxu1 %v3077_v38 }
 0x4cd   : > { %v1488_v3 = vpop.xlane.xlu0 %1487  ;;  %v1528_v47 = vsel %vm1084_vm3, %v3487_v53, 0.0 }
 0x4ce   : > { %1529 = vadd.xlane.f32.xlu0 %v1528_v47  ;;  %v1502_v54 = vsub.f32 %v3445_v12, %v1488_v3 }
 0x4d0   : > { %v1514_v57 = vmul.f32 1.442695, %v1502_v54 }
 0x4d1   : > { %v1494_v55 = vpop.xlane.xlu0 %1493 }
 0x4d2   : > { %v1504_v56 = vsub.f32 %v3447_v17, %v1494_v55 }
 0x4d4   : > { %v1518_v58 = vmul.f32 1.442695, %v1504_v56  ;;  %v3495_v63 = vpop.eup %2996 }
 0x4d5   : > { %v1571_v59 = vpop.permute.xlu0 %1570  ;;  %v1531_v2 = vsel %vm1084_vm3, %v3495_v63, 0.0 }
 0x4d6   : > { %2998 = vpow2.f32 %v1518_v58  ;;  %v1577_v60 = vsel %vm1575_vm4, %v1571_v59, 0 }
 0x4d7   : > { %2825 = vmatpush3.bf16.msra.mxu0 %v1577_v60  ;;  %3000 = vpow2.f32 %v1514_v57 }
 0x4d8   : > { %2836 = vmatprep.subr.bf16.mxu0 %v3077_v38 }
 0x4d9   : > { %v1716_v19 = vpop.permute.xlu0 %1715 }
 0x4db   : > { %1532 = vadd.xlane.f32.xlu1 %v1531_v2 }
 0x4e0   : > { %v3500_v5 = vpop.eup %2998 }
 0x4e1   : > { %v1540_v6 = vsel %vm1084_vm3, %v3500_v5, 0.0  ;;  %v3504_v8 = vpop.eup %3000 }
 0x4e2   : > { %1541 = vadd.xlane.f32.xlu0 %v1540_v6  ;;  %v1534_v9 = vsel %vm1084_vm3, %v3504_v8, 0.0 }
 0x4e6   : > { %1535 = vadd.xlane.f32.xlu0 %v1534_v9 }
 0x4fa   : > { %v1491_v11 = vpop.xlane.xlu1 %1490 }
 0x4fb   : > { %v1503_v12 = vsub.f32 %v1371_v33, %v1491_v11  ;;  %v1721_v33 = vsel %vm1575_vm4, %v1716_v19, 0 }
 0x4fc   : > { %1811 = vrot.lane.b32.xlu0 %v3354_v10, %s3083_s18 }
 0x4fd   : > { %v1516_v13 = vmul.f32 1.442695, %v1503_v12 }
 0x4fe   : > { %v1497_v16 = vpop.xlane.xlu1 %1496 }
 0x4ff   : > { %3002 = vpow2.f32 %v1516_v13  ;;  %v1505_v17 = vsub.f32 %v3466_v35, %v1497_v16 }
 0x500   : > { %1907 = vrot.lane.b32.xlu0 %v3361_v15, %s3083_s18 }
 0x501   : > { %v1520_v18 = vmul.f32 1.442695, %v1505_v17 }
 0x502   : > { %v1668_v25 = vpop.permute.xlu1 %1667 }
 0x503   : > { %3004 = vpow2.f32 %v1520_v18  ;;  %v1673_v27 = vsel %vm1575_vm4, %v1668_v25, 0 }
 0x509   : > { %v3513_v20 = vpop.eup %3002 }
 0x50a   : > { %v1524_v21 = vpop.xlane.xlu0 %1523  ;;  %v1537_v22 = vsel %vm1084_vm3, %v3513_v20, 0.0 }
 0x50b   : > { %3006 = vrcp.f32 %v1524_v21  ;;  %1538 = vadd.xlane.f32.xlu1 %v1537_v22 }
 0x50d   : > { %v3517_v10 = vpop.eup %3004 }
 0x50e   : > { %v1543_v23 = vsel %vm1084_vm3, %v3517_v10, 0.0 }
 0x50f   : > { %1544 = vadd.xlane.f32.xlu1 %v1543_v23 }
 0x515   : > { %v3007_v24 = vpop.eup %3006 }
 0x516   : > { %v1554_v15 = vmul.f32 %v3007_v24, %v3471_v36 }
 0x518   : > { %v1562_v26 = vpack.c.bf16 %v1554_v15, %v1554_v15 }
 0x51a   : > { %2827 = vmatmul.mubr.msk.bf16.vlgmr.msra.gmra.mrb[16].mxu0 %vm1084_vm3, %v1562_v26 }
 0x51b   : > { %2837 = vmatpush3.bf16.msra.mxu0 %v1673_v27  ;;  %2838 = vmatprep.mubr.msk.bf16.mxu0 %vm3078_vm2, %v3077_v38 }
 0x51c   : > { %2848 = vmatprep.subr.bf16.mxu0 %v3077_v38 }
 0x520   : > { %1859 = vrot.lane.b32.xlu1 %v3357_v14, %s3083_s18 }
 0x533   : > { %v1527_v28 = vpop.xlane.xlu1 %1526 }
 0x534   : > { %3008 = vrcp.f32 %v1527_v28 }
 0x537   : > { %v1764_v34 = vpop.permute.xlu1 %1763 }
 0x538   : > { %v1769_v36 = vsel %vm1575_vm4, %v1764_v34, 0 }
 0x53e   : > { %v3009_v29 = vpop.eup %3008 }
 0x53f   : > { %v1555_v30 = vmul.f32 %v3009_v29, %v3478_v42  ;;  %v2979_v29 = vld [vmem:[%s3243_s21 + $0x8] sm:$0xff]  }
 0x541   : > { %v1563_v31 = vpack.c.bf16 %v1555_v30, %v1555_v30  ;;  %v2016_v30 = vsel %vm934_vm1, %v2979_v29, 0 }
 0x543   : > { %2833 = vmatmul.mubr.msk.bf16.vlgmr.msra.gmra.mrb[20].mxu1 %vm1084_vm3, %v1563_v31 }
 0x544   : > { %2843 = vmatpush3.bf16.msra.mxu1 %v1721_v33  ;;  %2844 = vmatprep.mubr.msk.bf16.mxu1 %vm3078_vm2, %v3077_v38 }
 0x545   : > { %2854 = vmatprep.subr.bf16.mxu1 %v3077_v38 }
 0x55b   : > { %v1530_v62 = vpop.xlane.xlu0 %1529 }
 0x55c   : > { %3010 = vrcp.f32 %v1530_v62 }
 0x566   : > { %v3011_v14 = vpop.eup %3010 }
 0x567   : > { %v1556_v35 = vmul.f32 %v3011_v14, %v3487_v53 }
 0x568   : > { %v1533_v61 = vpop.xlane.xlu1 %1532 }
 0x569   : > { %3012 = vrcp.f32 %v1533_v61  ;;  %v1564_v7 = vpack.c.bf16 %v1556_v35, %v1556_v35 }
 0x56b   : > { %2839 = vmatmul.mubr.msk.bf16.vlgmr.msra.gmra.mrb[20].mxu0 %vm1084_vm3, %v1564_v7 }
 0x56c   : > { %2849 = vmatpush3.bf16.msra.mxu0 %v1769_v36  ;;  %2850 = vmatprep.mubr.msk.bf16.mxu0 %vm3078_vm2, %v3077_v38 }
 0x56d   : > { %2860 = vmatprep.subr.bf16.mxu0 %v3077_v38 }
 0x56f   : > { %v1542_v32 = vpop.xlane.xlu0 %1541 }
 0x573   : > { %v3013_v37 = vpop.eup %3012  ;;  %v1536_v39 = vpop.xlane.xlu0 %1535 }
 0x574   : > { %v1557_v41 = vmul.f32 %v3013_v37, %v3495_v63  ;;  %3014 = vrcp.f32 %v1536_v39 }
 0x575   : > { %3016 = vrcp.f32 %v1542_v32 }
 0x576   : > { %v1565_v42 = vpack.c.bf16 %v1557_v41, %v1557_v41 }
 0x577   : > { %v1812_v43 = vpop.permute.xlu0 %1811 }
 0x578   : > { %v1817_v44 = vsel %vm1575_vm4, %v1812_v43, 0  ;;  %2845 = vmatmul.mubr.msk.bf16.vlgmr.msra.gmra.mrb[24].mxu1 %vm1084_vm3, %v1565_v42 }
 0x579   : > { %2855 = vmatpush3.bf16.msra.mxu1 %v1817_v44  ;;  %2856 = vmatprep.mubr.msk.bf16.mxu1 %vm3078_vm2, %v3077_v38 }
 0x57a   : > { %2866 = vmatprep.subr.bf16.mxu1 %v3077_v38 }
 0x57b   : > { %v1908_v56 = vpop.permute.xlu0 %1907 }
 0x57c   : > { %v1913_v59 = vsel %vm1575_vm4, %v1908_v56, 0 }
 0x57e   : > { %v3015_v45 = vpop.eup %3014 }
 0x57f   : > { %v1558_v46 = vmul.f32 %v3015_v45, %v3504_v8  ;;  %v3017_v40 = vpop.eup %3016 }
 0x580   : > { %v1560_v52 = vmul.f32 %v3017_v40, %v3500_v5 }
 0x581   : > { %v1566_v4 = vpack.c.bf16 %v1558_v46, %v1558_v46 }
 0x582   : > { %v1568_v54 = vpack.c.bf16 %v1560_v52, %v1560_v52 }
 0x583   : > { %2851 = vmatmul.mubr.msk.bf16.vlgmr.msra.gmra.mrb[24].mxu0 %vm1084_vm3, %v1566_v4 }
 0x584   : > { %2862 = vmatprep.mubr.msk.bf16.mxu0 %vm3078_vm2, %v3077_v38 }
 0x598   : > { %v1539_v48 = vpop.xlane.xlu1 %1538 }
 0x599   : > { %3018 = vrcp.f32 %v1539_v48 }
 0x59c   : > { %v1545_v49 = vpop.xlane.xlu1 %1544 }
 0x59d   : > { %3020 = vrcp.f32 %v1545_v49 }
 0x5a0   : > { %v1860_v53 = vpop.permute.xlu1 %1859 }
 0x5a1   : > { %v1865_v3 = vsel %vm1575_vm4, %v1860_v53, 0 }
 0x5a2   : > { %2861 = vmatpush3.bf16.msra.mxu0 %v1865_v3 }
 0x5a3   : > { %v3019_v47 = vpop.eup %3018  ;;  %2872 = vmatprep.subr.bf16.mxu0 %v3077_v38 }
 0x5a4   : > { %v1559_v55 = vmul.f32 %v3019_v47, %v3513_v20  ;;  %v2978_v20 = vld [vmem:[%s3243_s21] sm:$0xff]   ;;  %s3086_s21 = smov 24  }
 0x5a5   : > { %2863 = vmatmul.mubr.msk.bf16.vlgmr.msra.gmra.mrb[28].mxu0 %vm1084_vm3, %v1568_v54  ;;  %v2013_v21 = vsel %vm934_vm1, %v2978_v20, 0 }
 0x5a6   : > { %v1567_v57 = vpack.c.bf16 %v1559_v55, %v1559_v55  ;;  %2876 = vmatprep.mubr.msk.bf16.mxu0 %vm3078_vm2, %v3077_v38 }
 0x5a7   : > { %v3021_v58 = vpop.eup %3020 }
 0x5a8   : > { %2857 = vmatmul.mubr.msk.bf16.vlgmr.msra.gmra.mrb[28].mxu1 %vm1084_vm3, %v1567_v57  ;;  %v1561_v60 = vmul.f32 %v3021_v58, %v3517_v10  ;;  %v2673_v58 = vld [vmem:[%s3748_s17] ss:$0 sm:$0xff] }
 0x5a9   : > { %2867 = vmatpush3.bf16.msra.mxu1 %v1913_v59  ;;  %2868 = vmatprep.mubr.msk.bf16.mxu1 %vm3078_vm2, %v3077_v38 }
 0x5aa   : > { %2880 = vmatprep.subr.bf16.mxu1 %v3077_v38  ;;  %v1569_v63 = vpack.c.bf16 %v1561_v60, %v1561_v60 }
 0x5ab   : > { %2873 = vmatpush3.bf16.xpose.msra.mxu0 %v2013_v21  ;;  %v2984_v21 = vld [vmem:[%s3261_s29 + $0x20] sm:$0xff]  }
 0x5ac   : > { %2874 = vmatprep.subr.bf16.mxu0 %v3077_v38 }
 0x5b0   : > { %2869 = vmatmul.mubr.msk.bf16.vlgmr.msra.gmra.mrb[32].mxu1 %vm1084_vm3, %v1569_v63 }
 0x5b1   : > { %2896 = vmatprep.mubr.msk.bf16.mxu1 %vm3078_vm2, %v3077_v38 }
 0x5b3   : > { %2875 = vmatpush3.bf16.xpose.msra.mxu0 %v2016_v30 }
 0x5b4   : > { %2900 = vmatprep.subr.bf16.mxu0 %v3077_v38 }
 0x5ed   : > { %v1613_v2 = vpop.f32.mrb[16].mxu0 }
 0x5ee   : > { %v2828_v5 = vpop.f32.mrb[17].mxu0 }
 0x5ef   : > { %v1616_v6 = vpop.f32.mrb[18].mxu0 }
 0x5f0   : > { %v2829_v8 = vpop.f32.mrb[19].mxu0 }
 0x616   : > { %v1661_v9 = vpop.f32.mrb[20].mxu1 }
 0x617   : > { %v2834_v11 = vpop.f32.mrb[21].mxu1 }
 0x618   : > { %v1664_v12 = vpop.f32.mrb[22].mxu1 }
 0x619   : > { %v2835_v13 = vpop.f32.mrb[23].mxu1 }
 0x61a   : > { %v2980_v13 = vld [vmem:[%s3261_s29] sm:$0xff]  }
 0x63e   : > { %v1709_v16 = vpop.f32.mrb[20].mxu0 }
 0x63f   : > { %v2840_v17 = vpop.f32.mrb[21].mxu0 }
 0x640   : > { %v1712_v18 = vpop.f32.mrb[22].mxu0  ;;  %v2981_v17 = vld [vmem:[%s3261_s29 + $0x8] sm:$0xff]  }
 0x641   : > { %v2841_v19 = vpop.f32.mrb[23].mxu0  ;;  %v2177_v18 = vsel %vm934_vm1, %v2981_v17, 0 }
 0x642   : > { %v2983_v19 = vld [vmem:[%s3261_s29 + $0x18] sm:$0xff]  }
 0x643   : > { %v2183_v20 = vsel %vm934_vm1, %v2983_v19, 0 }
 0x64b   : > { %v1757_v22 = vpop.f32.mrb[24].mxu1 }
 0x64c   : > { %v2955_v10 = vpack.i.bf16 %v1757_v22, %v1709_v16  ;;  %v2846_v23 = vpop.f32.mrb[25].mxu1  ;;  %v2174_v16 = vsel %vm934_vm1, %v2980_v13, 0  ;;  %v2186_v22 = vsel %vm934_vm1, %v2984_v21, 0 }
 0x64d   : > { %v1760_v24 = vpop.f32.mrb[26].mxu1  ;;  %2881 = vmatpush3.bf16.xpose.msra.mxu1 %v2174_v16 }
 0x64e   : > { %v2847_v15 = vpop.f32.mrb[27].mxu1  ;;  %2956 = vrot.lane.b32.xlu1 %v2955_v10, %s3084_s3  ;;  %2882 = vmatprep.subr.bf16.mxu1 %v3077_v38 }
 0x655   : > { %2883 = vmatpush3.bf16.xpose.msra.mxu1 %v2177_v18 }
 0x656   : > { %v1805_v25 = vpop.f32.mrb[24].mxu0  ;;  %2884 = vmatprep.subr.bf16.mxu1 %v3077_v38 }
 0x657   : > { %v2852_v26 = vpop.f32.mrb[25].mxu0 }
 0x658   : > { %v1808_v27 = vpop.f32.mrb[26].mxu0 }
 0x659   : > { %v2853_v28 = vpop.f32.mrb[27].mxu0 }
 0x678   : > { %v1901_v31 = vpop.f32.mrb[28].mxu0 }
 0x679   : > { %v2864_v33 = vpop.f32.mrb[29].mxu0 }
 0x67a   : > { %v1904_v62 = vpop.f32.mrb[30].mxu0 }
 0x67b   : > { %v1853_v34 = vpop.f32.mrb[28].mxu1  ;;  %v2865_v14 = vpop.f32.mrb[31].mxu0  ;;  %v2986_v62 = vld [vmem:[%s3261_s29 + $0x30] sm:$0xff]  }
 0x67c   : > { %v2960_v35 = vpack.i.bf16 %v1853_v34, %v1805_v25  ;;  %v2858_v61 = vpop.f32.mrb[29].mxu1  ;;  %v2192_v34 = vsel %vm934_vm1, %v2986_v62, 0  ;;  %v2987_v14 = vld [vmem:[%s3261_s29 + $0x38] sm:$0xff]  }
 0x67d   : > { %v1856_v7 = vpop.f32.mrb[30].mxu1 }
 0x67e   : > { %v2859_v36 = vpop.f32.mrb[31].mxu1  ;;  %2961 = vrot.lane.b32.xlu0 %v2960_v35, %s3085_s4  ;;  %v2195_v35 = vsel %vm934_vm1, %v2987_v14, 0  ;;  %s3751_s4 = scalar_lea.vmem %s3711_s12, %s3223_s0 }
 0x683   : > { %v1949_v32 = vpop.f32.mrb[32].mxu1 }
 0x684   : > { %v2965_v37 = vpack.i.bf16 %v1949_v32, %v1901_v31  ;;  %v2870_v39 = vpop.f32.mrb[33].mxu1  ;;  %v2985_v31 = vld [vmem:[%s3261_s29 + $0x28] sm:$0xff]  }
 0x685   : > { %v1952_v41 = vpop.f32.mrb[34].mxu1  ;;  %v2189_v33 = vsel %vm934_vm1, %v2985_v31, 0  ;;  %v3087_v31 = vmov 0  }
 0x686   : > { %v2871_v42 = vpop.f32.mrb[35].mxu1  ;;  %2966 = vrot.lane.b32.xlu1 %v2965_v37, %s3086_s21  ;;  %2971 = vset.pattern.permute.xlu0 %v3087_v31 }
 0x687   : > { %2970 = vset.pattern.permute.xlu1 %v3087_v31 }
 0x6c0   : > { %v2957_v43 = vpop.permute.xlu1 %2956 }
 0x6c1   : > { %v2959_v45 = vunpack.i.h.bf16 %v2957_v43  ;;  %v2958_v46 = vunpack.i.l.bf16 %v2957_v43 }
 0x6c3   : > { %v1980_v49 = vsel %vm1084_vm3, %v1661_v9, %v2959_v45  ;;  %v1979_v52 = vsel %vm1084_vm3, %v1613_v2, %v2958_v46 }
 0x6f0   : > { %v2962_v44 = vpop.permute.xlu0 %2961 }
 0x6f1   : > { %v2964_v4 = vunpack.i.h.bf16 %v2962_v44  ;;  %v2963_v48 = vunpack.i.l.bf16 %v2962_v44 }
 0x6f3   : > { %v1983_v47 = vsel %vm1981_vm5, %v1980_v49, %v2964_v4  ;;  %v1982_v54 = vsel %vm1981_vm5, %v1979_v52, %v2963_v48  ;;  %v2678_v4 = vld [vmem:[%s3750_s24] ss:$0 sm:$0xff]  ;;  %s3754_s24 = sld [smem:[#allocation16_spill]] (!%p2694_p5) }
 0x6f8   : > { %v2967_v40 = vpop.permute.xlu1 %2966 }
 0x6f9   : > { %v2969_v53 = vunpack.i.h.bf16 %v2967_v40  ;;  %v2968_v3 = vunpack.i.l.bf16 %v2967_v40 }
 0x6fb   : > { %v1986_v55 = vsel %vm1984_vm6, %v1983_v47, %v2969_v53  ;;  %v1985_v56 = vsel %vm1984_vm6, %v1982_v54, %v2968_v3  ;;  %v2988_v53 = vld [vmem:[%s3266_s7] sm:$0xff]   ;;  %v2989_v3 = vld [vmem:[%s3266_s7 + $0x8] sm:$0xff]  }
 0x6fc   : > { %v1987_v57 = vpack.c.bf16 %v1986_v55, %v1985_v56  ;;  %v2679_v47 = vld [vmem:[%s3751_s4] ss:$0 sm:$0xff]  ;;  %s3755_s4 = sld [smem:[#allocation18_spill]] (!%p2694_p5) }
 0x6fe   : > { %2877 = vmatmul.mubr.msk.bf16.vlgmr.msra.gmra.mrb[32].mxu0 %vm934_vm1, %v1987_v57 }
 0x6ff   : > { %2904 = vmatprep.mubr.msk.bf16.mxu0 %vm3078_vm2, %v3077_v38  ;;  %2901 = vmatpush3.bf16.xpose.msra.mxu0 %v2988_v53 }
 0x700   : > { %2902 = vmatprep.subr.bf16.mxu0 %v3077_v38 }
 0x707   : > { %2903 = vmatpush3.bf16.xpose.msra.mxu0 %v2989_v3 }
 0x7d1   : > { %v2052_v59 = vpop.f32.mrb[32].mxu0 }
 0x7d2   : > { %v2053_v60 = vadd.f32 %v2673_v58, %v2052_v59  ;;  %v2878_v63 = vpop.f32.mrb[33].mxu0 }
 0x7d3   : > { %v2055_v2 = vpop.f32.mrb[34].mxu0 }
 0x7d4   : > { %v2056_v5 = vadd.f32 %v2673_v58, %v2055_v2  ;;  %v2879_v6 = vpop.f32.mrb[35].mxu0  ;;  %v2059_v8 = vadd.f32 %v2053_v60, %v3324_v50  ;;  %v2982_v50 = vld [vmem:[%s3261_s29 + $0x10] sm:$0xff]   ;;  %s3749_s29 = scalar_lea.vmem %s3708_s9, %s3223_s0  ;;  %s3752_s0 = sld [smem:[#allocation14_spill]] (!%p2694_p5) }
 0x7d5   : > { %v2677_v43 = vld [vmem:[%s3749_s29] ss:$0 sm:$0xff]  ;;  %s3753_s29 = sld [smem:[#allocation15_spill]] (!%p2694_p5) }
 0x7d6   : > { %v2063_v9 = vsel %vm934_vm1, %v2059_v8, 0.0  ;;  %v2060_v11 = vadd.f32 %v2056_v5, %v3326_v51  ;;  %v2180_v51 = vsel %vm934_vm1, %v2982_v50, 0 }
 0x7d7   : > { %2064 = vadd.xlane.f32.xlu0 %v2063_v9  ;;  %2885 = vmatpush3.bf16.xpose.msra.mxu1 %v2180_v51 }
 0x7d8   : > { %v2066_v12 = vsel %vm934_vm1, %v2060_v11, 0.0  ;;  %2886 = vmatprep.subr.bf16.mxu1 %v3077_v38 }
 0x7d9   : > { %2067 = vadd.xlane.f32.xlu1 %v2066_v12 }
 0x7df   : > { %2887 = vmatpush3.bf16.xpose.msra.mxu1 %v2183_v20 }
 0x7e0   : > { %2888 = vmatprep.subr.bf16.mxu1 %v3077_v38 }
 0x7e7   : > { %2889 = vmatpush3.bf16.xpose.msra.mxu1 %v2186_v22  ;;  %v2689_v22 = vld [vmem:[%s806_s22] ss:$0 sm:$0xff] }
 0x7e8   : > { %2890 = vmatprep.subr.bf16.mxu1 %v3077_v38 }
 0x7ef   : > { %2891 = vmatpush3.bf16.xpose.msra.mxu1 %v2189_v33 }
 0x7f0   : > { %2892 = vmatprep.subr.bf16.mxu1 %v3077_v38 }
 0x7f7   : > { %2893 = vmatpush3.bf16.xpose.msra.mxu1 %v2192_v34 }
 0x7f8   : > { %2894 = vmatprep.subr.bf16.mxu1 %v3077_v38 }
 0x7ff   : > { %2895 = vmatpush3.bf16.xpose.msra.mxu1 %v2195_v35 }
 0x864   : > { %v2065_v10 = vpop.xlane.xlu0 %2064 }
 0x865   : > { %v2070_v23 = vmul.f32 0.03125, %v2065_v10 }
 0x866   : > { %v2068_v24 = vpop.xlane.xlu1 %2067 }
 0x867   : > { %v2072_v15 = vsub.f32 %v2059_v8, %v2070_v23  ;;  %v2071_v25 = vmul.f32 0.03125, %v2068_v24 }
 0x869   : > { %v2073_v26 = vsub.f32 %v2060_v11, %v2071_v25  ;;  %v2074_v27 = vmul.f32 %v2072_v15, %v2072_v15 }
 0x86b   : > { %v2076_v28 = vsel %vm934_vm1, %v2074_v27, 0.0  ;;  %v2075_v29 = vmul.f32 %v2073_v26, %v2073_v26 }
 0x86c   : > { %2077 = vadd.xlane.f32.xlu0 %v2076_v28 }
 0x86d   : > { %v2079_v30 = vsel %vm934_vm1, %v2075_v29, 0.0 }
 0x870   : > { %2080 = vadd.xlane.f32.xlu0 %v2079_v30 }
 0x8f9   : > { %v2078_v61 = vpop.xlane.xlu0 %2077 }
 0x8fa   : > { %v2082_v7 = vmul.f32 0.03125, %v2078_v61 }
 0x8fc   : > { %v2084_v36 = vadd.f32 1e-12, %v2082_v7 }
 0x8fd   : > { %v2081_v32 = vpop.xlane.xlu0 %2080 }
 0x8fe   : > { %3022 = vrsqrt.f32 %v2084_v36  ;;  %v2083_v37 = vmul.f32 0.03125, %v2081_v32 }
 0x900   : > { %v2085_v39 = vadd.f32 1e-12, %v2083_v37 }
 0x902   : > { %3024 = vrsqrt.f32 %v2085_v39 }
 0x908   : > { %v3023_v41 = vpop.eup %3022 }
 0x909   : > { %v2088_v42 = vmul.f32 %v3023_v41, %v2072_v15 }
 0x90b   : > { %v2096_v45 = vmul.f32 %v2677_v43, %v2088_v42 }
 0x90c   : > { %v3025_v44 = vpop.eup %3024 }
 0x90d   : > { %v2089_v46 = vmul.f32 %v3025_v44, %v2073_v26  ;;  %v2104_v40 = vadd.f32 %v2678_v4, %v2096_v45 }
 0x90f   : > { %v2097_v48 = vmul.f32 %v2677_v43, %v2089_v46 }
 0x911   : > { %v2105_v49 = vadd.f32 %v2678_v4, %v2097_v48  ;;  %v2692_v4 = vld [vmem:[%s809_s30] ss:$0 sm:$0xff] }
 0x913   : > { %v2106_v52 = vpack.c.bf16 %v2105_v49, %v2104_v40 }
 0x915   : > { %2897 = vmatmul.mubr.msk.bf16.vlgmr.msra.gmra.mrb[36].mxu1 %vm934_vm1, %v2106_v52 }
 0x9e8   : > { %v2231_v54 = vpop.f32.mrb[36].mxu1 }
 0x9e9   : > { %v2232_v55 = vadd.f32 %v2679_v47, %v2231_v54  ;;  %v2898_v56 = vpop.f32.mrb[37].mxu1 }
 0x9ea   : > { %v2234_v57 = vpop.f32.mrb[38].mxu1 }
 0x9eb   : > { %v2240_v58 = vmul.f32 0.044715, %v2232_v55  ;;  %v2235_v59 = vadd.f32 %v2679_v47, %v2234_v57  ;;  %v2899_v60 = vpop.f32.mrb[39].mxu1  ;;  %v2238_v18 = vmul.f32 0.5, %v2232_v55  ;;  %v2391_v57 = vld [vmem:[%s3752_s0] sm:$0x3] (!%p2694_p5) }
 0x9ec   : > { %v2403_v60 = vsel (!%p2694_p5), %vm934_vm1, %v2391_v57, 0 }
 0x9ed   : > { %v2242_v63 = vmul.f32 %v2240_v58, %v2232_v55  ;;  %v2241_v2 = vmul.f32 0.044715, %v2235_v59  ;;  %v2239_v50 = vmul.f32 0.5, %v2235_v59 }
 0x9ef   : > { %v2244_v5 = vmul.f32 %v2242_v63, %v2232_v55  ;;  %v2243_v6 = vmul.f32 %v2241_v2, %v2235_v59 }
 0x9f1   : > { %v2246_v8 = vadd.f32 %v2244_v5, %v2232_v55  ;;  %v2245_v38 = vmul.f32 %v2243_v6, %v2235_v59  ;;  %v2695_v5 = vld [vmem:[%s3753_s29] ss:$0 sm:$0xff] (!%p2694_p5) }
 0x9f3   : > { %v2248_v9 = vmul.f32 0.7978846, %v2246_v8  ;;  %v2247_v11 = vadd.f32 %v2245_v38, %v2235_v59  ;;  %v3088_v59 = vmov (!%p2694_p5), 0.0  }
 0x9f4   : > { %2908 = vmatprep.subr.bf16.mxu0 (!%p2694_p5), %v3088_v59 }
 0x9f5   : > { %3026 = vtanh.f32 %v2248_v9  ;;  %v2249_v12 = vmul.f32 0.7978846, %v2247_v11 }
 0x9f7   : > { %3028 = vtanh.f32 %v2249_v12 }
 0x9ff   : > { %v3027_v13 = vpop.eup %3026 }
 0xa00   : > { %v2252_v16 = vadd.f32 1.0, %v3027_v13 }
 0xa01   : > { %v3029_v17 = vpop.eup %3028 }
 0xa02   : > { %v2253_v51 = vadd.f32 1.0, %v3029_v17  ;;  %v2254_v19 = vmul.f32 %v2252_v16, %v2238_v18 }
 0xa04   : > { %v2255_v20 = vmul.f32 %v2253_v51, %v2239_v50 }
 0xa06   : > { %v2256_v21 = vpack.c.bf16 %v2255_v20, %v2254_v19 }
 0xa08   : > { %2905 = vmatmul.mubr.bf16.vlgmr.msra.gmra.mrb[36].mxu0 %v2256_v21  ;;  %v2457_v21 = vld [vmem:[%s3754_s24] sm:$0x3] (!%p2694_p5) }
 0xa09   : > { %2910 = vmatprep.mubr.msk.bf16.mxu0 (!%p2694_p5), %vm3089_vm8, %v3088_v59  ;;  %2909 = vmatpush3.bf16.xpose.msra.mxu0 (!%p2694_p5), %v2403_v60 }
 0xadb   : > { %v2314_v10 = vpop.f32.mrb[36].mxu0 }
 0xadc   : > { %v2315_v23 = vadd.f32 %v2689_v22, %v2314_v10  ;;  %v2906_v24 = vpop.f32.mrb[37].mxu0 }
 0xadd   : > { %v2317_v15 = vpop.f32.mrb[38].mxu0 }
 0xade   : > { %v2318_v25 = vadd.f32 %v2689_v22, %v2317_v15  ;;  %v2907_v26 = vpop.f32.mrb[39].mxu0  ;;  %v2321_v27 = vadd.f32 %v2315_v23, %v2104_v40 }
 0xae0   : > { %v2325_v28 = vsel %vm934_vm1, %v2321_v27, 0.0  ;;  %v2322_v29 = vadd.f32 %v2318_v25, %v2105_v49 }
 0xae1   : > { %2326 = vadd.xlane.f32.xlu1 %v2325_v28 }
 0xae2   : > { %v2328_v30 = vsel %vm934_vm1, %v2322_v29, 0.0 }
 0xae3   : > { %2329 = vadd.xlane.f32.xlu0 %v2328_v30 }
 0xb6e   : > { %v2327_v33 = vpop.xlane.xlu1 %2326 }
 0xb6f   : > { %v2331_v62 = vmul.f32 0.03125, %v2327_v33 }
 0xb70   : > { %v2330_v34 = vpop.xlane.xlu0 %2329 }
 0xb71   : > { %v2333_v14 = vsub.f32 %v2321_v27, %v2331_v62  ;;  %v2332_v35 = vmul.f32 0.03125, %v2330_v34 }
 0xb73   : > { %v2334_v61 = vsub.f32 %v2322_v29, %v2332_v35  ;;  %v2335_v7 = vmul.f32 %v2333_v14, %v2333_v14 }
 0xb75   : > { %v2337_v36 = vsel %vm934_vm1, %v2335_v7, 0.0  ;;  %v2336_v32 = vmul.f32 %v2334_v61, %v2334_v61 }
 0xb76   : > { %2338 = vadd.xlane.f32.xlu1 %v2337_v36 }
 0xb77   : > { %v2340_v37 = vsel %vm934_vm1, %v2336_v32, 0.0 }
 0xb78   : > { %2341 = vadd.xlane.f32.xlu0 %v2340_v37 }
 0xb87   : > { %2369 = vperm.xlu1 %2970, %v3215_v0   ;;  %v2693_v0 = vld [vmem:[%s812_s27] ss:$0 sm:$0xff] }
 0xb8e   : > { %2374 = vperm.xlu0 %2971, %v3220_v1  }
 0xc03   : > { %v2339_v39 = vpop.xlane.xlu1 %2338 }
 0xc04   : > { %v2343_v41 = vmul.f32 0.03125, %v2339_v39 }
 0xc05   : > { %v2342_v42 = vpop.xlane.xlu0 %2341 }
 0xc06   : > { %v2345_v43 = vadd.f32 1e-12, %v2343_v41  ;;  %v2344_v44 = vmul.f32 0.03125, %v2342_v42 }
 0xc07   : > { %v2370_v52 = vpop.permute.xlu1 %2369 }
 0xc08   : > { %3030 = vrsqrt.f32 %v2345_v43  ;;  %v2346_v45 = vadd.f32 1e-12, %v2344_v44 }
 0xc0a   : > { %3032 = vrsqrt.f32 %v2346_v45 }
 0xc0d   : > { %v2375_v47 = vpop.permute.xlu0 %2374 }
 0xc12   : > { %v3031_v46 = vpop.eup %3030 }
 0xc13   : > { %v2349_v48 = vmul.f32 %v3031_v46, %v2333_v14 }
 0xc14   : > { %v3033_v40 = vpop.eup %3032 }
 0xc15   : > { %v2357_v1 = vmul.f32 %v2692_v4, %v2349_v48  ;;  %v2350_v49 = vmul.f32 %v3033_v40, %v2334_v61 }
 0xc17   : > { %v2365_v53 = vadd.f32 %v2693_v0, %v2357_v1  ;;  %v2358_v3 = vmul.f32 %v2692_v4, %v2350_v49  ;;  %2384 = sbr.rel (%p2694_p5) target bundleno = 3784 (0xec8), region = 108 }
 0xc19   : > { %v2377_v54 = vmul.f32 %v2370_v52, %v2365_v53  ;;  %v2366_v55 = vadd.f32 %v2693_v0, %v2358_v3 }
 0xc1b   : > { %2379 = vst.msk [vmem:[#allocation2] sm:$0xff] %vm934_vm1, %v2377_v54  ;;  %v2378_v56 = vmul.f32 %v2375_v47, %v2366_v55 }
 0xc1d   : > { %2380 = vst.msk [vmem:[#allocation2 + $0x8] sm:$0xff] %vm934_vm1, %v2378_v56  ;;  %v2386_v58 = vrot.slane (!%p2694_p5), %v2378_v56, 7 }
 0xc1f   : > { %v2389_v63 = vsel %vm2388_vm7, %v2377_v54, %v2386_v58 }
 0xc20   : > { %v2390_v2 = vpack.c.bf16 %v2389_v63, %v2389_v63 }
 0xc22   : > { %2911 = vmatmul.mubr.msk.bf16.vlgmr.msra.gmra.mrb[0].mxu0 %vm934_vm1, %v2390_v2 }
 0xcf5   : > { %v2439_v6 = vpop.f32.mrb[0].mxu0 }
 0xcf6   : > { %v2440_v8 = vadd.f32 %v2695_v5, %v2439_v6  ;;  %v2912_v38 = vpop.f32.mrb[1].mxu0 }
 0xcf7   : > { %v2442_v9 = vpop.f32.mrb[2].mxu0 }
 0xcf8   : > { %v2913_v11 = vpop.f32.mrb[3].mxu0  ;;  %v2446_v12 = vsel %vm2445_vm9, %v2440_v8, -inf  ;;  %2466 = vst.msk [vmem:[#allocation3] sm:$0x3] %vm2445_vm9, %v2440_v8 }
 0xcf9   : > { %2447 = vmax.xlane.f32.xlu0 %v2446_v12 }
 0xd86   : > { %v2448_v13 = vpop.xlane.xlu0 %2447 }
 0xd87   : > { %v2449_v16 = vsub.f32 %v2440_v8, %v2448_v13 }
 0xd89   : > { %v2450_v17 = vmul.f32 1.442695, %v2449_v16 }
 0xd8b   : > { %3034 = vpow2.f32 %v2450_v17 }
 0xd95   : > { %v3035_v18 = vpop.eup %3034 }
 0xd96   : > { %v2452_v50 = vsel %vm2445_vm9, %v3035_v18, 0.0 }
 0xd97   : > { %2453 = vadd.xlane.f32.xlu0 %v2452_v50 }
 0xe24   : > { %v2454_v51 = vpop.xlane.xlu0 %2453 }
 0xe25   : > { %3036 = vlog2.f32 %v2454_v51 }
 0xe2f   : > { %v3037_v19 = vpop.eup %3036 }
 0xe30   : > { %v2456_v20 = vmul.f32 0.6931472, %v3037_v19 }
 0xe32   : > { %v2458_v22 = vsub.f32 %v2449_v16, %v2456_v20 }
 0xe34   : > { %v2459_v10 = vmul.f32 %v2458_v22, %v2457_v21 }
 0xe36   : > { %v2460_v23 = vsel %vm2445_vm9, %v2459_v10, 0.0 }
 0xe37   : > { %2461 = vadd.xlane.f32.xlu1 %v2460_v23 }
 0xec4   : > { %v2462_v24 = vpop.xlane.xlu1 %2461 }
 0xec5   : > { %v2463_v15 = vsub.f32 0.0, %v2462_v24 }
 0xec7   : > { %2465 = vst.msk [vmem:[%s3755_s4] sm:$0x3] %vm2464_vm10, %v2463_v15 }
 0xec8 PF: > { %p2919_p6 = scmp.eq.s32.totalorder %s3207_s25, 1  ;;  %s3090_s7 = smov [#allocation3]  }
 0xec9   : > { %s2474_s21 = sshll.u32 %s3090_s7, 4  ;;  %s2475_s21 = int_to_ptr.vmem [resolvable:$true] %s2474_s21 }
 0xeca   : > { %s3038_s22 = scalar_lea.vmem %s2475_s21, 32  ;;  %p3045_p10 = scmp.lt.s32.totalorder %s2475_s21, %s2475_s21 }
 0xecb   : > { %p3039_p7 = scmp.ne.s32.totalorder %s2475_s21, %s3038_s22  ;;  %p3046_p11 = scmp.lt.s32.totalorder %s3038_s22, %s3038_s22 }
 0xecd   : > { %p3040_p8 = pnand %p3039_p7, %p2919_p6  ;;  %p3047_p12 = por %p3046_p11, %p3045_p10 }
 0xecf   : > { %p3041_p9 = pneg %p3040_p8 }
 0xed1   : > { %p3048_p13 = pnand %p3047_p12, %p3041_p9 }
 0xed3   : > { %3051 = shalt.err (!%p3048_p13)
}
 0xed4   : > { %s3756_s17 = sld [smem:[#allocation17_spill]] }
 0xeda   : > { %s3052_s30 = scalar_lea.hbm %s3756_s17, 32 }
 0xedb   : > { %p3053_p0 = scmp.ne.s32.totalorder %s3756_s17, %s3052_s30  ;;  %p3058_p3 = scmp.lt.u32.totalorder %s3052_s30, %s3756_s17 }
 0xedd   : > { %p3054_p1 = pnand %p3053_p0, %p2919_p6 }
 0xedf   : > { %p3055_p2 = pneg %p3054_p1 }
 0xee1   : > { %p3060_p4 = pnand %p3058_p3, %p3055_p2 }
 0xee3   : > { %3063 = shalt.err (!%p3060_p4)
}
 0xee4   : > { %2916 = dma.vmem_to_hbm [thread:$0]  (%p2919_p6), %s2475_s21, 32, %s3756_s17, [#allocation4]  }
 0xee5   : > { %3069 = dma.done.wait (%p2919_p6), [#allocation4], 32  }
 0xee6   : > { %3071 = vsyncadd (%p2919_p6), [#allocation4], 4294967264 }
 0xee7 PF: > { %s3757_s26 = sld [smem:[#allocation6_spill]] }
 0xeed   : > { %s33_s2 = sadd.s32 1, %s3757_s26  }
 0xeee   : > { %p30_p5 = scmp.ge.s32.totalorder %s33_s2, 4  }
 0xef0   :  { %32 = sbr.rel (!%p30_p5) target bundleno = 14 (0xe), region = 176 }
 0xef7   :  { %2493 = vsyncpa [#allocation4], 1 }
 0xef8   :  { %2495 = vsyncpa [#allocation4 + $0x1], 1 }

</bundles_post_ra>
